<compile_context>
chip_gen: v7x
topology: tpu7x:2x2x1
jax: 0.10.0
libtpu: 0.0.40
codegen_flags: <defaults>
</compile_context>

<pallas_src>
import jax
import jax.numpy as jnp
from jax import lax
from jax.experimental import pallas as pl
from jax.experimental.pallas import tpu as pltpu

# ----------------------------- synthetic config ------------------------------
TOTAL_BONES = 4            # cfg.total_bones
MW_VOL_SIZE = 8            # cfg.mweight_volume.volume_size
MW_EMBED = 32              # cfg.mweight_volume.embedding_size
VOX_SIZE = 8               # voxel grid resolution
K0_DIM = 4                 # cfg.voxel.k0_dim
VOX_CH = K0_DIM * 3        # voxel feature channels (embedder input dims)
MLP_WIDTH = 32             # cfg.canonical_mlp.mlp_width
MLP_DEPTH = 6              # cfg.canonical_mlp.mlp_depth
SKIPS = (4,)
POS_MULTIRES = 4           # cfg.canonical_mlp.multires
DIR_MULTIRES = 2           # cfg.canonical_mlp.dir_multires
VOXEL_MULTIRES = 2         # cfg.voxel.voxel_multires
TIME_MULTIRES = 2          # cfg.canonical_mlp.time_multires
N_SAMPLES = 16             # cfg.N_samples
N_RAYS = 8
NETCHUNK = 4096            # lane extent cap of the MLP kernel (VMEM-safe on v7x)
RAY_TILE = 128             # lane extent of the raw2outputs kernel
PERTURB = 0.0              # cfg.perturb (deterministic)


def _round_up(x, m):
    return ((x + m - 1) // m) * m


# ------------------------------ embedders (glue) -----------------------------
def make_embedder(multires, input_dims):
    freqs = [2.0 ** i for i in range(multires)]
    out_dim = input_dims * (1 + 2 * multires)

    def embed(x):
        outs = [x]
        for f in freqs:
            outs.append(jnp.sin(x * f))
            outs.append(jnp.cos(x * f))
        return jnp.concatenate(outs, axis=-1)

    return embed, out_dim


pos_embed_fn, POS_EMB_DIM = make_embedder(POS_MULTIRES, 3)
dir_embed_fn, DIR_EMB_DIM = make_embedder(DIR_MULTIRES, 3)
voxel_embed_fn, VOXEL_EMB_DIM = make_embedder(VOXEL_MULTIRES, VOX_CH)
time_embed_fn, TIME_EMB_DIM = make_embedder(TIME_MULTIRES, 1)
MLP_IN_DIM = VOXEL_EMB_DIM + POS_EMB_DIM + VOXEL_EMB_DIM + TIME_EMB_DIM

D_IN_PAD = _round_up(MLP_IN_DIM, 16)   # bf16-sublane-friendly feature pad
DIR_PAD = MLP_WIDTH                    # dir embedding padded to slab width
assert DIR_EMB_DIM <= DIR_PAD


# ------------------------ packed parameter slab layout ------------------------
def _rows_layout(sizes, align):
    offs, cur = {}, 0
    for name, r in sizes:
        offs[name] = (cur, r)
        cur += _round_up(r, align)
    return offs, cur


# hidden-weight slab: everything with <= MLP_WIDTH columns, bf16, 16-aligned rows
W_HID_SIZES = ([(f'w{i}', MLP_WIDTH) for i in range(1, MLP_DEPTH)]
               + [('w_fa', MLP_WIDTH + 1), ('w_r0f', MLP_WIDTH),
                  ('w_r0d', MLP_WIDTH), ('w_r1', 3)])
W_HID_OFFS, W_HID_ROWS = _rows_layout(W_HID_SIZES, 16)

# bias slab: f32 column vectors, 8-aligned rows
B_SIZES = ([(f'b{i}', MLP_WIDTH) for i in range(MLP_DEPTH)]
           + [('b_fa', MLP_WIDTH + 1), ('b_r0', MLP_WIDTH), ('b_r1', 3)])
B_OFFS, B_ROWS = _rows_layout(B_SIZES, 8)


# -------------------------- Pallas kernel: canonical MLP ---------------------
# Transposed layout: activations (features, chunk) so points sit on lanes.
# Inputs: x (D_IN_PAD, C) bf16, dir (DIR_PAD, C) bf16,
#         w_in (2W, D_IN_PAD) bf16  [rows 0..W-1 = layer0, rows W..2W-1 = skip x-part]
#         w_hid (W_HID_ROWS, W) bf16, b_all (B_ROWS, 1) f32.
def _cnl_mlp_kernel(x_ref, d_ref, w_in_ref, w_hid_ref, b_ref, rgb_ref, sig_ref):
    f32 = jnp.float32
    bf16 = jnp.bfloat16

    xb = x_ref[...]                                   # (D_IN_PAD, C) bf16
    db = d_ref[...]                                   # (DIR_PAD,  C) bf16
    w_in = w_in_ref[...]                              # (2W, D_IN_PAD) bf16

    def W(name):
        off, rows = W_HID_OFFS[name]
        return w_hid_ref[off:off + rows, :]

    def B(name):
        off, rows = B_OFFS[name]
        return b_ref[off:off + rows, :]

    # layer 0
    h = jnp.maximum(
        jnp.dot(w_in[:MLP_WIDTH, :], xb, preferred_element_type=f32) + B('b0'), 0.0)
    # layers 1 .. depth-1, skip connection (reference order cat([x, h])) at SKIPS
    for i in range(1, MLP_DEPTH):
        hb = h.astype(bf16)
        z = jnp.dot(W(f'w{i}'), hb, preferred_element_type=f32) + B(f'b{i}')
        if i in SKIPS:
            z = z + jnp.dot(w_in[MLP_WIDTH:2 * MLP_WIDTH, :], xb,
                            preferred_element_type=f32)
        h = jnp.maximum(z, 0.0)                       # (W, C) f32

    # fused feature|alpha head
    hb = h.astype(bf16)
    fa = jnp.dot(W('w_fa'), hb, preferred_element_type=f32) + B('b_fa')   # (W+1, C)
    feat = fa[:MLP_WIDTH, :]
    alpha = fa[MLP_WIDTH:MLP_WIDTH + 1, :]

    # rgb branch (fan-out padded to W; padded rows are exactly zero)
    hr = jnp.maximum(
        jnp.dot(W('w_r0f'), feat.astype(bf16), preferred_element_type=f32)
        + jnp.dot(W('w_r0d'), db, preferred_element_type=f32)
        + B('b_r0'), 0.0)                                                 # (W, C)
    rgb = jnp.dot(W('w_r1'), hr.astype(bf16), preferred_element_type=f32) + B('b_r1')

    rgb_ref[...] = rgb                                # (3, C)
    sig_ref[...] = alpha                              # (1, C)


def cnl_mlp_pallas(x_t, dir_t, slabs, chunk=None):
    """x_t: (D_IN_PAD, N) bf16; dir_t: (DIR_PAD, N) bf16.  One call for all points."""
    w_in, w_hid, b_all = slabs['w_in'], slabs['w_hid'], slabs['b_all']
    d_in, n = x_t.shape
    d_dir = dir_t.shape[0]
    if chunk is None:
        chunk = min(NETCHUNK, _round_up(n, 128))
    n_pad = _round_up(n, chunk)
    if n_pad != n:
        x_t = jnp.pad(x_t, ((0, 0), (0, n_pad - n)))
        dir_t = jnp.pad(dir_t, ((0, 0), (0, n_pad - n)))
    grid = (n_pad // chunk,)

    in_specs = [
        pl.BlockSpec((d_in, chunk), lambda i: (0, i)),
        pl.BlockSpec((d_dir, chunk), lambda i: (0, i)),
        pl.BlockSpec(w_in.shape, lambda i: (0, 0)),
        pl.BlockSpec(w_hid.shape, lambda i: (0, 0)),
        pl.BlockSpec(b_all.shape, lambda i: (0, 0)),
    ]
    out_specs = (
        pl.BlockSpec((3, chunk), lambda i: (0, i)),
        pl.BlockSpec((1, chunk), lambda i: (0, i)),
    )
    out_shape = (
        jax.ShapeDtypeStruct((3, n_pad), jnp.float32),
        jax.ShapeDtypeStruct((1, n_pad), jnp.float32),
    )

    flops = int(2 * n_pad * (2 * MLP_WIDTH * D_IN_PAD
                             + (MLP_DEPTH - 1) * MLP_WIDTH * MLP_WIDTH
                             + (MLP_WIDTH + 1) * MLP_WIDTH
                             + 2 * MLP_WIDTH * MLP_WIDTH + 3 * MLP_WIDTH))
    bytes_accessed = int((x_t.size + dir_t.size + w_in.size + w_hid.size) * 2
                         + b_all.size * 4 + 4 * n_pad * 4)

    rgb, sig = pl.pallas_call(
        _cnl_mlp_kernel,
        out_shape=out_shape,
        grid_spec=pltpu.PrefetchScalarGridSpec(
            num_scalar_prefetch=0,
            grid=grid,
            in_specs=in_specs,
            out_specs=out_specs,
        ),
        compiler_params=pltpu.CompilerParams(
            dimension_semantics=("parallel",),
            vmem_limit_bytes=32 * 1024 * 1024),
        cost_estimate=pl.CostEstimate(flops=flops, transcendentals=0,
                                      bytes_accessed=bytes_accessed),
    )(x_t, dir_t, w_in, w_hid, b_all)
    return rgb[:, :n], sig[:, :n]


# ---------------------- Pallas kernel: raw2outputs rendering -----------------
# Rays on lanes: sigma/mask/z/dists are (S, R_tile); rgb is (3, S, R_tile).
def _raw2outputs_kernel(rgb_ref, sig_ref, mask_ref, z_ref, dist_ref, bg_ref,
                        rgbo_ref, acco_ref, deptho_ref):
    raw_rgb = rgb_ref[...]                            # (3, S, R)
    sigma = sig_ref[...]                              # (S, R)
    mask = mask_ref[...]
    z = z_ref[...]
    dists = dist_ref[...]
    bgn = bg_ref[...] * (1.0 / 255.0)                 # (3, 1)

    rgb = 1.0 / (1.0 + jnp.exp(-raw_rgb))             # sigmoid
    softplus = jnp.maximum(sigma, 0.0) + jnp.log(1.0 + jnp.exp(-jnp.abs(sigma)))
    alpha = (1.0 - jnp.exp(-softplus * dists)) * mask           # (S, R)

    # exclusive transmittance: trans[s, r] = prod_{s' < s} (1 - alpha[s', r] + 1e-10)
    s = alpha.shape[0]
    row = lax.broadcasted_iota(jnp.int32, (s, s), 0)
    col = lax.broadcasted_iota(jnp.int32, (s, s), 1)
    tri = (col < row).astype(jnp.float32)             # strictly lower triangular
    log1ma = jnp.log(1.0 - alpha + 1e-10)
    trans = jnp.exp(jnp.dot(tri, log1ma, preferred_element_type=jnp.float32))
    w = alpha * trans                                 # (S, R)

    acc = jnp.sum(w, axis=0, keepdims=True)                       # (1, R)
    depth = jnp.sum(w * z, axis=0, keepdims=True)                 # (1, R)
    # sum_s w*rgb + (1-acc)*bg == sum_s w*(rgb - bg) + bg
    rgb_map = jnp.sum(w[None, :, :] * (rgb - bgn[:, :, None]), axis=1) + bgn  # (3, R)

    rgbo_ref[...] = rgb_map
    acco_ref[...] = acc
    deptho_ref[...] = depth


def raw2outputs_pallas(raw_rgb, raw_sigma, raw_mask, z_vals, rays_d, bgcolor):
    """raw_rgb: (3, R, S); raw_sigma/raw_mask/z_vals: (R, S); rays_d: (R, 3)."""
    r, s = z_vals.shape
    dists = jnp.concatenate(
        [z_vals[:, 1:] - z_vals[:, :-1],
         jnp.full((r, 1), 1e10, dtype=jnp.float32)], axis=-1)
    dists = dists * jnp.linalg.norm(rays_d, axis=-1, keepdims=True)
    bg = bgcolor.reshape(3, 1).astype(jnp.float32)

    # transpose so rays sit on lanes; pad ray axis to the lane tile
    rgb_t = jnp.transpose(raw_rgb.astype(jnp.float32), (0, 2, 1))  # (3, S, R)
    sig_t = raw_sigma.astype(jnp.float32).T                        # (S, R)
    mask_t = raw_mask.astype(jnp.float32).T
    z_t = z_vals.astype(jnp.float32).T
    dist_t = dists.astype(jnp.float32).T

    r_pad = _round_up(r, RAY_TILE)

    def padr(a):
        if r_pad == r:
            return a
        pad = [(0, 0)] * (a.ndim - 1) + [(0, r_pad - r)]
        return jnp.pad(a, pad)

    rgb_t, sig_t, mask_t, z_t, dist_t = map(padr, (rgb_t, sig_t, mask_t, z_t, dist_t))
    grid = (r_pad // RAY_TILE,)

    in_specs = [
        pl.BlockSpec((3, s, RAY_TILE), lambda i: (0, 0, i)),
        pl.BlockSpec((s, RAY_TILE), lambda i: (0, i)),
        pl.BlockSpec((s, RAY_TILE), lambda i: (0, i)),
        pl.BlockSpec((s, RAY_TILE), lambda i: (0, i)),
        pl.BlockSpec((s, RAY_TILE), lambda i: (0, i)),
        pl.BlockSpec((3, 1), lambda i: (0, 0)),
    ]
    out_specs = (
        pl.BlockSpec((3, RAY_TILE), lambda i: (0, i)),
        pl.BlockSpec((1, RAY_TILE), lambda i: (0, i)),
        pl.BlockSpec((1, RAY_TILE), lambda i: (0, i)),
    )
    out_shape = (
        jax.ShapeDtypeStruct((3, r_pad), jnp.float32),
        jax.ShapeDtypeStruct((1, r_pad), jnp.float32),
        jax.ShapeDtypeStruct((1, r_pad), jnp.float32),
    )

    flops = int(r_pad * (2 * s * s + 14 * s + 20))
    transc = int(r_pad * s * 6)
    bytes_accessed = int((7 * s + 5) * r_pad * 4)

    rgbo, acc, depth = pl.pallas_call(
        _raw2outputs_kernel,
        out_shape=out_shape,
        grid_spec=pltpu.PrefetchScalarGridSpec(
            num_scalar_prefetch=0,
            grid=grid,
            in_specs=in_specs,
            out_specs=out_specs,
        ),
        compiler_params=pltpu.CompilerParams(
            dimension_semantics=("parallel",),
            vmem_limit_bytes=32 * 1024 * 1024),
        cost_estimate=pl.CostEstimate(flops=flops, transcendentals=transc,
                                      bytes_accessed=bytes_accessed),
    )(rgb_t, sig_t, mask_t, z_t, dist_t, bg)
    return rgbo[:, :r].T, acc[0, :r], depth[0, :r]


# --------------------------- plain-JAX glue modules ---------------------------
def rodrigues(rvec):
    """rvec: (N, 3) -> rotation matrices (N, 3, 3)."""
    theta = jnp.sqrt(jnp.sum(rvec ** 2, axis=-1, keepdims=True) + 1e-12)
    r = rvec / theta
    cos = jnp.cos(theta)[..., None]
    sin = jnp.sin(theta)[..., None]
    rx, ry, rz = r[:, 0], r[:, 1], r[:, 2]
    zeros = jnp.zeros_like(rx)
    K = jnp.stack([
        jnp.stack([zeros, -rz, ry], -1),
        jnp.stack([rz, zeros, -rx], -1),
        jnp.stack([-ry, rx, zeros], -1)], axis=1)
    eye = jnp.eye(3, dtype=jnp.float32)[None]
    return eye + sin * K + (1.0 - cos) * jnp.matmul(K, K)


def pose_refine_apply(p, posevec):
    h = jnp.maximum(posevec @ p['w0'] + p['b0'], 0.0)
    h = jnp.maximum(h @ p['w1'] + p['b1'], 0.0)
    rvec = (h @ p['w2'] + p['b2']).reshape(-1, 3)
    Rs = rodrigues(rvec)
    return Rs.reshape(1, TOTAL_BONES - 1, 3, 3)


def multiply_corrected_Rs(Rs, correct_Rs):
    return jnp.matmul(Rs.reshape(-1, 3, 3),
                      correct_Rs.reshape(-1, 3, 3)).reshape(-1, TOTAL_BONES - 1, 3, 3)


def motion_basis(dst_Rs, dst_Ts, cnl_gtfms):
    b, k = dst_Rs.shape[:2]
    G = jnp.zeros((b, k, 4, 4), jnp.float32)
    G = G.at[:, :, :3, :3].set(dst_Rs)
    G = G.at[:, :, :3, 3].set(dst_Ts)
    G = G.at[:, :, 3, 3].set(1.0)
    f = jnp.matmul(G, jnp.linalg.inv(cnl_gtfms))
    return f[:, :, :3, :3], f[:, :, :3, 3]


def mweight_vol_decode(p, priors):
    logits = (p['embedding'] @ p['w'] + p['b']).reshape(
        1, TOTAL_BONES + 1, MW_VOL_SIZE, MW_VOL_SIZE, MW_VOL_SIZE)
    return jax.nn.softmax(logits + jnp.log(priors), axis=1)


# TODO(synk): F.grid_sample (trilinear data-dependent gather) has no clean Pallas TPU
# lowering; implemented in plain JAX with explicit corner gathers instead.
def grid_sample_3d(vol, coords):
    """vol: (C, D, H, W); coords: (N, 3) as (x, y, z) in [-1, 1].
    Trilinear, zeros padding, align_corners=True (matches F.grid_sample)."""
    c, d, h, w = vol.shape
    x, y, z = coords[:, 0], coords[:, 1], coords[:, 2]
    ix = (x + 1.0) * 0.5 * (w - 1)
    iy = (y + 1.0) * 0.5 * (h - 1)
    iz = (z + 1.0) * 0.5 * (d - 1)
    x0 = jnp.floor(ix); x1 = x0 + 1.0
    y0 = jnp.floor(iy); y1 = y0 + 1.0
    z0 = jnp.floor(iz); z1 = z0 + 1.0
    wx1 = ix - x0; wx0 = 1.0 - wx1
    wy1 = iy - y0; wy0 = 1.0 - wy1
    wz1 = iz - z0; wz0 = 1.0 - wz1

    def corner(xi, yi, zi, wt):
        inb = ((xi >= 0) & (xi <= w - 1) & (yi >= 0) & (yi <= h - 1)
               & (zi >= 0) & (zi <= d - 1))
        xi_c = jnp.clip(xi, 0, w - 1).astype(jnp.int32)
        yi_c = jnp.clip(yi, 0, h - 1).astype(jnp.int32)
        zi_c = jnp.clip(zi, 0, d - 1).astype(jnp.int32)
        vals = vol[:, zi_c, yi_c, xi_c]                      # (C, N)
        return jnp.where(inb[None, :], vals, 0.0) * wt[None, :]

    out = (corner(x0, y0, z0, wx0 * wy0 * wz0) + corner(x1, y0, z0, wx1 * wy0 * wz0)
           + corner(x0, y1, z0, wx0 * wy1 * wz0) + corner(x1, y1, z0, wx1 * wy1 * wz0)
           + corner(x0, y0, z1, wx0 * wy0 * wz1) + corner(x1, y0, z1, wx1 * wy0 * wz1)
           + corner(x0, y1, z1, wx0 * wy1 * wz1) + corner(x1, y1, z1, wx1 * wy1 * wz1))
    return out.T                                             # (N, C)


def sample_motion_fields(pts, motion_scale_Rs, motion_Ts, motion_weights_vol,
                         bbox_min, bbox_scale):
    orig_shape = pts.shape
    pts_flat = pts.reshape(-1, 3)                            # (N, 3)
    motion_weights = motion_weights_vol[:-1]                 # (K, V, V, V)

    # batched bone transforms: pos[k] = pts @ R_k^T + T_k
    pos = jnp.einsum('kij,nj->kni', motion_scale_Rs, pts_flat) + motion_Ts[:, None, :]
    pos_n = (pos - bbox_min[None, None, :]) * bbox_scale[None, None, :] - 1.0

    # vmapped trilinear weight lookup over bones
    w = jax.vmap(lambda v, c: grid_sample_3d(v[None], c))(motion_weights, pos_n)
    bw = jnp.transpose(w[..., 0])                            # (N, K)
    bw_sum = jnp.sum(bw, axis=-1, keepdims=True)

    x_skel = jnp.einsum('nk,kni->ni', bw, pos) / jnp.maximum(bw_sum, 1e-4)

    x_skel = x_skel.reshape(orig_shape[:2] + (3,))
    fg_mask = bw_sum.reshape(orig_shape[:2] + (1,))
    return x_skel, fg_mask


def voxel_query(p, xyz, subject_id, bbox_min, bbox_scale):
    coords = (xyz - bbox_min[None, :]) * bbox_scale[None, :] - 1.0
    general = grid_sample_3d(p['general'], coords)                   # (N, VOX_CH)
    individual = grid_sample_3d(p['individual'][subject_id], coords)
    return general, individual


# ------------------------------ forward pipeline ------------------------------
def query_mlp(params, pos_xyz, ob_xyz, rays_d_br, time_id, subject_id,
              bbox_min, bbox_scale):
    r, s = pos_xyz.shape[0], pos_xyz.shape[1]
    pos_flat = pos_xyz.reshape(-1, 3)
    obpos_flat = ob_xyz.reshape(-1, 3)
    dir_flat = rays_d_br.reshape(-1, 3)

    general, individual = voxel_query(params['voxel'], pos_flat, subject_id,
                                      bbox_min, bbox_scale)
    general_emb = voxel_embed_fn(general)
    individual_emb = voxel_embed_fn(individual)
    obxyz_emb = pos_embed_fn(obpos_flat)
    dir_emb = dir_embed_fn(dir_flat)
    time_col = jnp.ones((pos_flat.shape[0], 1), jnp.float32) * time_id
    time_emb = time_embed_fn(time_col)

    x_in = jnp.concatenate([general_emb, obxyz_emb, individual_emb, time_emb], axis=-1)
    x_in = jnp.pad(x_in, ((0, 0), (0, D_IN_PAD - MLP_IN_DIM)))
    dir_emb = jnp.pad(dir_emb, ((0, 0), (0, DIR_PAD - DIR_EMB_DIM)))

    # transpose to (features, points) so the Pallas MLP kernel is lane-dense
    rgb_flat, sig_flat = cnl_mlp_pallas(
        x_in.T.astype(jnp.bfloat16), dir_emb.T.astype(jnp.bfloat16),
        params['cnl_mlp'])
    raw_rgb = rgb_flat.reshape(3, r, s)
    raw_sigma = sig_flat.reshape(r, s)
    return raw_rgb, raw_sigma


def render_rays(params, ray_batch, motion_scale_Rs, motion_Ts, motion_weights_vol,
                cnl_bbox_min_xyz, cnl_bbox_scale_xyz, bgcolor, time_id, subject_id):
    n_rays = ray_batch.shape[0]
    rays_o, rays_d = ray_batch[:, 0:3], ray_batch[:, 3:6]
    bounds = ray_batch[..., 6:8].reshape(-1, 1, 2)
    near, far = bounds[..., 0], bounds[..., 1]

    t_vals = jnp.linspace(0.0, 1.0, N_SAMPLES, dtype=jnp.float32)
    z_vals = near * (1.0 - t_vals) + far * t_vals
    z_vals = jnp.broadcast_to(z_vals, (n_rays, N_SAMPLES))
    # cfg.perturb == 0.0 -> no stratified sampling (deterministic)

    pts = rays_o[..., None, :] + rays_d[..., None, :] * z_vals[..., :, None]
    rays_d_br = rays_d[:, None, :] + jnp.zeros_like(pts)

    x_skel, pts_mask = sample_motion_fields(
        pts, motion_scale_Rs[0], motion_Ts[0], motion_weights_vol,
        cnl_bbox_min_xyz, cnl_bbox_scale_xyz)

    raw_rgb, raw_sigma = query_mlp(params, x_skel, pts, rays_d_br, time_id,
                                   subject_id, cnl_bbox_min_xyz, cnl_bbox_scale_xyz)

    rgb_map, acc_map, depth_map = raw2outputs_pallas(
        raw_rgb, raw_sigma, pts_mask[..., 0], z_vals, rays_d, bgcolor)
    return {'rgb': rgb_map, 'alpha': acc_map, 'depth': depth_map}


def network_forward(params, rays, dst_Rs, dst_Ts, cnl_gtfms, motion_weights_priors,
                    dst_posevec, near, far, bgcolor, time_id, subject_id,
                    cnl_bbox_min_xyz, cnl_bbox_scale_xyz):
    dst_Rs = dst_Rs[None, ...]
    dst_Ts = dst_Ts[None, ...]
    dst_posevec = dst_posevec[None, ...]
    cnl_gtfms = cnl_gtfms[None, ...]
    motion_weights_priors = motion_weights_priors[None, ...]

    refined_Rs = pose_refine_apply(params['pose_refine'], dst_posevec)
    dst_Rs_no_root = multiply_corrected_Rs(dst_Rs[:, 1:, ...], refined_Rs)
    dst_Rs = jnp.concatenate([dst_Rs[:, 0:1, ...], dst_Rs_no_root], axis=1)
    # this pose-refine module emits Rs only (refined_Ts is None)

    motion_scale_Rs, motion_Ts = motion_basis(dst_Rs, dst_Ts, cnl_gtfms)
    motion_weights_vol = mweight_vol_decode(params['mweight'], motion_weights_priors)[0]

    rays_o, rays_d = rays
    rays_shape = rays_d.shape
    rays_o = rays_o.reshape(-1, 3).astype(jnp.float32)
    rays_d = rays_d.reshape(-1, 3).astype(jnp.float32)
    packed = jnp.concatenate([rays_o, rays_d, near, far], axis=-1)

    # all rays in one pass: both Pallas kernels see a single lane-padded call
    all_ret = render_rays(
        params, packed,
        motion_scale_Rs=motion_scale_Rs, motion_Ts=motion_Ts,
        motion_weights_vol=motion_weights_vol,
        cnl_bbox_min_xyz=cnl_bbox_min_xyz, cnl_bbox_scale_xyz=cnl_bbox_scale_xyz,
        bgcolor=bgcolor, time_id=time_id, subject_id=subject_id)

    out = {}
    for k, v in all_ret.items():
        out[k] = v.reshape(tuple(rays_shape[:-1]) + tuple(v.shape[1:]))
    return out


# ------------------------------ parameter packing ------------------------------
def pack_cnl_mlp_params(mlp):
    """Transpose / split / fuse / pad the canonical-MLP params into 3 dense slabs.

    Input order: [W_i, b_i]*MLP_DEPTH, wa, ba, wf, bf, wr0, br0, wr1, br1 with
    W_i (fan_in, fan_out), b (1, fan_out).
    Assumed reference concat orders: skip layer input = cat([x_embed, h], -1);
    rgb-branch input = cat([feature, dir_embedded], -1)."""
    bf16 = jnp.bfloat16

    layer_w, layer_b = [], []
    idx = 0
    for _ in range(MLP_DEPTH):
        layer_w.append(mlp[idx]); layer_b.append(mlp[idx + 1]); idx += 2
    wa, ba, wf, bf_, wr0, br0, wr1, br1 = mlp[idx:idx + 8]

    def pad_rows_cols(a, rows, cols):
        out = jnp.zeros((rows, cols), a.dtype)
        return out.at[:a.shape[0], :a.shape[1]].set(a)

    # input slab: layer0 weight + skip-layer x-part, cols padded to D_IN_PAD
    w0t = layer_w[0].T                                    # (W, MLP_IN_DIM)
    wst = layer_w[SKIPS[0]].T                             # (W, MLP_IN_DIM + W), cols [x | h]
    ws_x = wst[:, :MLP_IN_DIM]
    ws_h = wst[:, MLP_IN_DIM:]
    w_in = jnp.concatenate(
        [pad_rows_cols(w0t, MLP_WIDTH, D_IN_PAD),
         pad_rows_cols(ws_x, MLP_WIDTH, D_IN_PAD)], axis=0).astype(bf16)

    # hidden slab pieces (all <= MLP_WIDTH columns)
    pieces = {}
    for i in range(1, MLP_DEPTH):
        pieces[f'w{i}'] = ws_h if i in SKIPS else layer_w[i].T
    pieces['w_fa'] = jnp.concatenate([wf.T, wa.T], axis=0)       # (W+1, W) [feat; alpha]
    wr0t = wr0.T                                                 # (W//2, W + DIR)
    pieces['w_r0f'] = wr0t[:, :MLP_WIDTH]                        # (W//2, W)
    pieces['w_r0d'] = wr0t[:, MLP_WIDTH:]                        # (W//2, DIR)
    pieces['w_r1'] = wr1.T                                       # (3, W//2)

    w_hid = jnp.zeros((W_HID_ROWS, MLP_WIDTH), bf16)
    for name, _ in W_HID_SIZES:
        off, _ = W_HID_OFFS[name]
        a = pieces[name]
        w_hid = w_hid.at[off:off + a.shape[0], :a.shape[1]].set(a.astype(bf16))

    # bias slab (f32 column vectors); padded rows stay exactly zero
    bias_pieces = {f'b{i}': layer_b[i].reshape(-1) for i in range(MLP_DEPTH)}
    bias_pieces['b_fa'] = jnp.concatenate([bf_.reshape(-1), ba.reshape(-1)])
    bias_pieces['b_r0'] = br0.reshape(-1)
    bias_pieces['b_r1'] = br1.reshape(-1)
    b_all = jnp.zeros((B_ROWS, 1), jnp.float32)
    for name, _ in B_SIZES:
        off, _ = B_OFFS[name]
        v = bias_pieces[name]
        b_all = b_all.at[off:off + v.shape[0], 0].set(v.astype(jnp.float32))

    return dict(w_in=w_in, w_hid=w_hid, b_all=b_all)


def init_params(key):
    keys = list(jax.random.split(key, 64))
    key_iter = iter(keys)

    def dense(fan_in, fan_out, scale=1.0):
        k = next(key_iter)
        w = jax.random.normal(k, (fan_in, fan_out), jnp.float32) * (scale / jnp.sqrt(fan_in))
        b = jnp.zeros((1, fan_out), jnp.float32)
        return w, b

    params = {}

    # pose refiner (BodyPoseRefiner-style tiny MLP -> rodrigues)
    w0, b0 = dense(3 * (TOTAL_BONES - 1), 32)
    w1, b1 = dense(32, 32)
    w2, b2 = dense(32, 3 * (TOTAL_BONES - 1), scale=0.01)
    params['pose_refine'] = dict(w0=w0, b0=b0, w1=w1, b1=b1, w2=w2, b2=b2)

    # motion-weight volume decoder (const embedding -> logits volume)
    emb = jax.random.normal(next(key_iter), (1, MW_EMBED), jnp.float32) * 0.1
    wd, bd = dense(MW_EMBED, (TOTAL_BONES + 1) * MW_VOL_SIZE ** 3, scale=0.1)
    params['mweight'] = dict(embedding=emb, w=wd, b=bd)

    # voxel feature grids (general + per-subject individual)
    params['voxel'] = dict(
        general=jax.random.normal(next(key_iter),
                                  (VOX_CH, VOX_SIZE, VOX_SIZE, VOX_SIZE), jnp.float32) * 0.1,
        individual=jax.random.normal(next(key_iter),
                                     (2, VOX_CH, VOX_SIZE, VOX_SIZE, VOX_SIZE), jnp.float32) * 0.1,
    )

    # canonical MLP (initialized in reference orientation, then packed for Pallas)
    mlp = []
    for i in range(MLP_DEPTH):
        if i == 0:
            fan_in = MLP_IN_DIM
        elif i in SKIPS:
            fan_in = MLP_IN_DIM + MLP_WIDTH          # cat([x_embed, h])
        else:
            fan_in = MLP_WIDTH
        w, b = dense(fan_in, MLP_WIDTH)
        mlp += [w, b]
    wa, ba = dense(MLP_WIDTH, 1)
    wf, bf = dense(MLP_WIDTH, MLP_WIDTH)
    wr0, br0 = dense(MLP_WIDTH + DIR_EMB_DIM, MLP_WIDTH // 2)
    wr1, br1 = dense(MLP_WIDTH // 2, 3)
    mlp += [wa, ba, wf, bf, wr0, br0, wr1, br1]
    params['cnl_mlp'] = pack_cnl_mlp_params(tuple(mlp))
    return params


# ------------------------------------ main ------------------------------------
if __name__ == "__main__":
    root_key = jax.random.PRNGKey(0)
    pkey, dkey = jax.random.split(root_key)
    params = init_params(pkey)

    dkeys = jax.random.split(dkey, 8)
    rays_o = jax.random.uniform(dkeys[0], (N_RAYS, 3), jnp.float32, -0.5, 0.5)
    rays_d = jax.random.normal(dkeys[1], (N_RAYS, 3), jnp.float32)
    rays_d = rays_d / jnp.linalg.norm(rays_d, axis=-1, keepdims=True)
    near = jnp.full((N_RAYS, 1), 0.5, jnp.float32)
    far = jnp.full((N_RAYS, 1), 2.5, jnp.float32)

    dst_Rs = rodrigues(jax.random.normal(dkeys[2], (TOTAL_BONES, 3), jnp.float32) * 0.3)
    dst_Ts = jax.random.normal(dkeys[3], (TOTAL_BONES, 3), jnp.float32) * 0.1
    cnl_gtfms = jnp.tile(jnp.eye(4, dtype=jnp.float32)[None], (TOTAL_BONES, 1, 1))
    cnl_gtfms = cnl_gtfms.at[:, :3, 3].set(
        jax.random.normal(dkeys[4], (TOTAL_BONES, 3), jnp.float32) * 0.1)
    motion_weights_priors = jax.nn.softmax(
        jax.random.normal(dkeys[5], (TOTAL_BONES + 1, MW_VOL_SIZE, MW_VOL_SIZE, MW_VOL_SIZE),
                          jnp.float32), axis=0)
    dst_posevec = jax.random.normal(dkeys[6], (3 * (TOTAL_BONES - 1),), jnp.float32) * 0.1

    cnl_bbox_min_xyz = jnp.array([-1.3, -1.3, -1.3], jnp.float32)
    cnl_bbox_max_xyz = jnp.array([1.3, 1.3, 1.3], jnp.float32)
    cnl_bbox_scale_xyz = 2.0 / (cnl_bbox_max_xyz - cnl_bbox_min_xyz)
    bgcolor = jnp.array([10.0, 20.0, 30.0], jnp.float32)

    fwd = jax.jit(network_forward, static_argnames=('subject_id',))
    out = fwd(
        params, (rays_o, rays_d), dst_Rs, dst_Ts, cnl_gtfms, motion_weights_priors,
        dst_posevec, near, far, bgcolor=bgcolor, time_id=0.3, subject_id=0,
        cnl_bbox_min_xyz=cnl_bbox_min_xyz, cnl_bbox_scale_xyz=cnl_bbox_scale_xyz)

    jax.block_until_ready(out['rgb'])
    jax.block_until_ready(out['alpha'])
    jax.block_until_ready(out['depth'])
    assert out['rgb'].shape == (N_RAYS, 3)
    assert out['alpha'].shape == (N_RAYS,)
    assert out['depth'].shape == (N_RAYS,)
    assert bool(jnp.all(jnp.isfinite(out['rgb'])))
    assert bool(jnp.all(jnp.isfinite(out['alpha'])))
    assert bool(jnp.all(jnp.isfinite(out['depth'])))
    print("KERNEL_OK")
</pallas_src>

<mosaic_0001>
module attributes {stable_mosaic.version = 11 : i64} {
  func.func @_cnl_mlp_kernel(%arg0: i32, %arg1: memref<160x128xbf16, #tpu.memory_space<vmem>>, %arg2: memref<32x128xbf16, #tpu.memory_space<vmem>>, %arg3: memref<64x160xbf16, #tpu.memory_space<vmem>>, %arg4: memref<288x32xbf16, #tpu.memory_space<vmem>>, %arg5: memref<272x1xf32, #tpu.memory_space<vmem>>, %arg6: memref<3x128xf32, #tpu.memory_space<vmem>>, %arg7: memref<1x128xf32, #tpu.memory_space<vmem>>) attributes {dimension_semantics = [#tpu.dimension_semantics<parallel>], iteration_bounds = array<i64: 1>, scalar_prefetch = 0 : i64, scratch_operands = 0 : i64, tpu.core_type = #tpu.core_type<tc>, window_params = [{transform_indices = @transform_0, window_bounds = array<i64: 160, 128>}, {transform_indices = @transform_1, window_bounds = array<i64: 32, 128>}, {pipeline_mode = #tpu.pipeline_mode<synchronous>, transform_indices = @transform_2, window_bounds = array<i64: 64, 160>}, {pipeline_mode = #tpu.pipeline_mode<synchronous>, transform_indices = @transform_3, window_bounds = array<i64: 288, 32>}, {pipeline_mode = #tpu.pipeline_mode<synchronous>, transform_indices = @transform_4, window_bounds = array<i64: 272, 1>}, {transform_indices = @transform_5, window_bounds = array<i64: 3, 128>}, {transform_indices = @transform_6, window_bounds = array<i64: 1, 128>}]} {
    %c0 = arith.constant 0 : index
    %c0_0 = arith.constant 0 : index
    %0 = vector.load %arg1[%c0, %c0_0] : memref<160x128xbf16, #tpu.memory_space<vmem>>, vector<160x128xbf16>
    %c0_1 = arith.constant 0 : index
    %c0_2 = arith.constant 0 : index
    %1 = vector.load %arg2[%c0_1, %c0_2] : memref<32x128xbf16, #tpu.memory_space<vmem>>, vector<32x128xbf16>
    %c0_3 = arith.constant 0 : index
    %c0_4 = arith.constant 0 : index
    %2 = vector.load %arg3[%c0_3, %c0_4] : memref<64x160xbf16, #tpu.memory_space<vmem>>, vector<64x160xbf16>
    %3 = vector.extract_strided_slice %2 {offsets = [0, 0], sizes = [32, 160], strides = [1, 1]} : vector<64x160xbf16> to vector<32x160xbf16>
    %cst = arith.constant dense<0.000000e+00> : vector<32x128xf32>
    %4 = tpu.matmul %3, %0, %cst {dimension_numbers = #tpu.dot_dimension_numbers<[1], [0], [0], [1], [0, 0, 1, 1], [], []>} : vector<32x160xbf16>, vector<160x128xbf16>, vector<32x128xf32> -> vector<32x128xf32>
    %c0_5 = arith.constant 0 : index
    %c0_6 = arith.constant 0 : index
    %5 = vector.load %arg5[%c0_5, %c0_6] : memref<272x1xf32, #tpu.memory_space<vmem>>, vector<32x1xf32>
    %6 = vector.broadcast %5 : vector<32x1xf32> to vector<32x128xf32>
    %7 = arith.addf %4, %6 : vector<32x128xf32>
    %cst_7 = arith.constant 0.000000e+00 : f32
    %8 = vector.broadcast %cst_7 : f32 to vector<32x128xf32>
    %9 = arith.maximumf %7, %8 : vector<32x128xf32>
    %10 = arith.truncf %9 : vector<32x128xf32> to vector<32x128xbf16>
    %c0_8 = arith.constant 0 : index
    %c0_9 = arith.constant 0 : index
    %11 = vector.load %arg4[%c0_8, %c0_9] : memref<288x32xbf16, #tpu.memory_space<vmem>>, vector<32x32xbf16>
    %cst_10 = arith.constant dense<0.000000e+00> : vector<32x128xf32>
    %12 = tpu.matmul %11, %10, %cst_10 {dimension_numbers = #tpu.dot_dimension_numbers<[1], [0], [0], [1], [0, 0, 1, 1], [], []>} : vector<32x32xbf16>, vector<32x128xbf16>, vector<32x128xf32> -> vector<32x128xf32>
    %c32 = arith.constant 32 : index
    %c0_11 = arith.constant 0 : index
    %13 = vector.load %arg5[%c32, %c0_11] : memref<272x1xf32, #tpu.memory_space<vmem>>, vector<32x1xf32>
    %14 = vector.broadcast %13 : vector<32x1xf32> to vector<32x128xf32>
    %15 = arith.addf %12, %14 : vector<32x128xf32>
    %cst_12 = arith.constant 0.000000e+00 : f32
    %16 = vector.broadcast %cst_12 : f32 to vector<32x128xf32>
    %17 = arith.maximumf %15, %16 : vector<32x128xf32>
    %18 = arith.truncf %17 : vector<32x128xf32> to vector<32x128xbf16>
    %c32_13 = arith.constant 32 : index
    %c0_14 = arith.constant 0 : index
    %19 = vector.load %arg4[%c32_13, %c0_14] : memref<288x32xbf16, #tpu.memory_space<vmem>>, vector<32x32xbf16>
    %cst_15 = arith.constant dense<0.000000e+00> : vector<32x128xf32>
    %20 = tpu.matmul %19, %18, %cst_15 {dimension_numbers = #tpu.dot_dimension_numbers<[1], [0], [0], [1], [0, 0, 1, 1], [], []>} : vector<32x32xbf16>, vector<32x128xbf16>, vector<32x128xf32> -> vector<32x128xf32>
    %c64 = arith.constant 64 : index
    %c0_16 = arith.constant 0 : index
    %21 = vector.load %arg5[%c64, %c0_16] : memref<272x1xf32, #tpu.memory_space<vmem>>, vector<32x1xf32>
    %22 = vector.broadcast %21 : vector<32x1xf32> to vector<32x128xf32>
    %23 = arith.addf %20, %22 : vector<32x128xf32>
    %cst_17 = arith.constant 0.000000e+00 : f32
    %24 = vector.broadcast %cst_17 : f32 to vector<32x128xf32>
    %25 = arith.maximumf %23, %24 : vector<32x128xf32>
    %26 = arith.truncf %25 : vector<32x128xf32> to vector<32x128xbf16>
    %c64_18 = arith.constant 64 : index
    %c0_19 = arith.constant 0 : index
    %27 = vector.load %arg4[%c64_18, %c0_19] : memref<288x32xbf16, #tpu.memory_space<vmem>>, vector<32x32xbf16>
    %cst_20 = arith.constant dense<0.000000e+00> : vector<32x128xf32>
    %28 = tpu.matmul %27, %26, %cst_20 {dimension_numbers = #tpu.dot_dimension_numbers<[1], [0], [0], [1], [0, 0, 1, 1], [], []>} : vector<32x32xbf16>, vector<32x128xbf16>, vector<32x128xf32> -> vector<32x128xf32>
    %c96 = arith.constant 96 : index
    %c0_21 = arith.constant 0 : index
    %29 = vector.load %arg5[%c96, %c0_21] : memref<272x1xf32, #tpu.memory_space<vmem>>, vector<32x1xf32>
    %30 = vector.broadcast %29 : vector<32x1xf32> to vector<32x128xf32>
    %31 = arith.addf %28, %30 : vector<32x128xf32>
    %cst_22 = arith.constant 0.000000e+00 : f32
    %32 = vector.broadcast %cst_22 : f32 to vector<32x128xf32>
    %33 = arith.maximumf %31, %32 : vector<32x128xf32>
    %34 = arith.truncf %33 : vector<32x128xf32> to vector<32x128xbf16>
    %c96_23 = arith.constant 96 : index
    %c0_24 = arith.constant 0 : index
    %35 = vector.load %arg4[%c96_23, %c0_24] : memref<288x32xbf16, #tpu.memory_space<vmem>>, vector<32x32xbf16>
    %cst_25 = arith.constant dense<0.000000e+00> : vector<32x128xf32>
    %36 = tpu.matmul %35, %34, %cst_25 {dimension_numbers = #tpu.dot_dimension_numbers<[1], [0], [0], [1], [0, 0, 1, 1], [], []>} : vector<32x32xbf16>, vector<32x128xbf16>, vector<32x128xf32> -> vector<32x128xf32>
    %c128 = arith.constant 128 : index
    %c0_26 = arith.constant 0 : index
    %37 = vector.load %arg5[%c128, %c0_26] : memref<272x1xf32, #tpu.memory_space<vmem>>, vector<32x1xf32>
    %38 = vector.broadcast %37 : vector<32x1xf32> to vector<32x128xf32>
    %39 = arith.addf %36, %38 : vector<32x128xf32>
    %40 = vector.extract_strided_slice %2 {offsets = [32, 0], sizes = [32, 160], strides = [1, 1]} : vector<64x160xbf16> to vector<32x160xbf16>
    %cst_27 = arith.constant dense<0.000000e+00> : vector<32x128xf32>
    %41 = tpu.matmul %40, %0, %cst_27 {dimension_numbers = #tpu.dot_dimension_numbers<[1], [0], [0], [1], [0, 0, 1, 1], [], []>} : vector<32x160xbf16>, vector<160x128xbf16>, vector<32x128xf32> -> vector<32x128xf32>
    %42 = arith.addf %39, %41 : vector<32x128xf32>
    %cst_28 = arith.constant 0.000000e+00 : f32
    %43 = vector.broadcast %cst_28 : f32 to vector<32x128xf32>
    %44 = arith.maximumf %42, %43 : vector<32x128xf32>
    %45 = arith.truncf %44 : vector<32x128xf32> to vector<32x128xbf16>
    %c128_29 = arith.constant 128 : index
    %c0_30 = arith.constant 0 : index
    %46 = vector.load %arg4[%c128_29, %c0_30] : memref<288x32xbf16, #tpu.memory_space<vmem>>, vector<32x32xbf16>
    %cst_31 = arith.constant dense<0.000000e+00> : vector<32x128xf32>
    %47 = tpu.matmul %46, %45, %cst_31 {dimension_numbers = #tpu.dot_dimension_numbers<[1], [0], [0], [1], [0, 0, 1, 1], [], []>} : vector<32x32xbf16>, vector<32x128xbf16>, vector<32x128xf32> -> vector<32x128xf32>
    %c160 = arith.constant 160 : index
    %c0_32 = arith.constant 0 : index
    %48 = vector.load %arg5[%c160, %c0_32] : memref<272x1xf32, #tpu.memory_space<vmem>>, vector<32x1xf32>
    %49 = vector.broadcast %48 : vector<32x1xf32> to vector<32x128xf32>
    %50 = arith.addf %47, %49 : vector<32x128xf32>
    %cst_33 = arith.constant 0.000000e+00 : f32
    %51 = vector.broadcast %cst_33 : f32 to vector<32x128xf32>
    %52 = arith.maximumf %50, %51 : vector<32x128xf32>
    %53 = arith.truncf %52 : vector<32x128xf32> to vector<32x128xbf16>
    %c160_34 = arith.constant 160 : index
    %c0_35 = arith.constant 0 : index
    %54 = vector.load %arg4[%c160_34, %c0_35] : memref<288x32xbf16, #tpu.memory_space<vmem>>, vector<33x32xbf16>
    %cst_36 = arith.constant dense<0.000000e+00> : vector<33x128xf32>
    %55 = tpu.matmul %54, %53, %cst_36 {dimension_numbers = #tpu.dot_dimension_numbers<[1], [0], [0], [1], [0, 0, 1, 1], [], []>} : vector<33x32xbf16>, vector<32x128xbf16>, vector<33x128xf32> -> vector<33x128xf32>
    %c192 = arith.constant 192 : index
    %c0_37 = arith.constant 0 : index
    %56 = vector.load %arg5[%c192, %c0_37] : memref<272x1xf32, #tpu.memory_space<vmem>>, vector<33x1xf32>
    %57 = vector.broadcast %56 : vector<33x1xf32> to vector<33x128xf32>
    %58 = arith.addf %55, %57 : vector<33x128xf32>
    %59 = vector.extract_strided_slice %58 {offsets = [0, 0], sizes = [32, 128], strides = [1, 1]} : vector<33x128xf32> to vector<32x128xf32>
    %60 = vector.extract_strided_slice %58 {offsets = [32, 0], sizes = [1, 128], strides = [1, 1]} : vector<33x128xf32> to vector<1x128xf32>
    %c208 = arith.constant 208 : index
    %c0_38 = arith.constant 0 : index
    %61 = vector.load %arg4[%c208, %c0_38] : memref<288x32xbf16, #tpu.memory_space<vmem>>, vector<32x32xbf16>
    %62 = arith.truncf %59 : vector<32x128xf32> to vector<32x128xbf16>
    %cst_39 = arith.constant dense<0.000000e+00> : vector<32x128xf32>
    %63 = tpu.matmul %61, %62, %cst_39 {dimension_numbers = #tpu.dot_dimension_numbers<[1], [0], [0], [1], [0, 0, 1, 1], [], []>} : vector<32x32xbf16>, vector<32x128xbf16>, vector<32x128xf32> -> vector<32x128xf32>
    %c240 = arith.constant 240 : index
    %c0_40 = arith.constant 0 : index
    %64 = vector.load %arg4[%c240, %c0_40] : memref<288x32xbf16, #tpu.memory_space<vmem>>, vector<32x32xbf16>
    %cst_41 = arith.constant dense<0.000000e+00> : vector<32x128xf32>
    %65 = tpu.matmul %64, %1, %cst_41 {dimension_numbers = #tpu.dot_dimension_numbers<[1], [0], [0], [1], [0, 0, 1, 1], [], []>} : vector<32x32xbf16>, vector<32x128xbf16>, vector<32x128xf32> -> vector<32x128xf32>
    %66 = arith.addf %63, %65 : vector<32x128xf32>
    %c232 = arith.constant 232 : index
    %c0_42 = arith.constant 0 : index
    %67 = vector.load %arg5[%c232, %c0_42] : memref<272x1xf32, #tpu.memory_space<vmem>>, vector<32x1xf32>
    %68 = vector.broadcast %67 : vector<32x1xf32> to vector<32x128xf32>
    %69 = arith.addf %66, %68 : vector<32x128xf32>
    %cst_43 = arith.constant 0.000000e+00 : f32
    %70 = vector.broadcast %cst_43 : f32 to vector<32x128xf32>
    %71 = arith.maximumf %69, %70 : vector<32x128xf32>
    %c272 = arith.constant 272 : index
    %c0_44 = arith.constant 0 : index
    %72 = vector.load %arg4[%c272, %c0_44] : memref<288x32xbf16, #tpu.memory_space<vmem>>, vector<3x32xbf16>
    %73 = arith.truncf %71 : vector<32x128xf32> to vector<32x128xbf16>
    %cst_45 = arith.constant dense<0.000000e+00> : vector<3x128xf32>
    %74 = tpu.matmul %72, %73, %cst_45 {dimension_numbers = #tpu.dot_dimension_numbers<[1], [0], [0], [1], [0, 0, 1, 1], [], []>} : vector<3x32xbf16>, vector<32x128xbf16>, vector<3x128xf32> -> vector<3x128xf32>
    %c264 = arith.constant 264 : index
    %c0_46 = arith.constant 0 : index
    %75 = vector.load %arg5[%c264, %c0_46] : memref<272x1xf32, #tpu.memory_space<vmem>>, vector<3x1xf32>
    %76 = vector.broadcast %75 : vector<3x1xf32> to vector<3x128xf32>
    %77 = arith.addf %74, %76 : vector<3x128xf32>
    %c0_47 = arith.constant 0 : index
    %c0_48 = arith.constant 0 : index
    %78 = vector.load %arg6[%c0_47, %c0_48] : memref<3x128xf32, #tpu.memory_space<vmem>>, vector<3x128xf32>
    tpu.vector_store %arg6[%c0_47, %c0_48], %77 {strides = array<i32>} : memref<3x128xf32, #tpu.memory_space<vmem>>, vector<3x128xf32>,
    %c0_49 = arith.constant 0 : index
    %c0_50 = arith.constant 0 : index
    %79 = vector.load %arg7[%c0_49, %c0_50] : memref<1x128xf32, #tpu.memory_space<vmem>>, vector<1x128xf32>
    tpu.vector_store %arg7[%c0_49, %c0_50], %60 {strides = array<i32>} : memref<1x128xf32, #tpu.memory_space<vmem>>, vector<1x128xf32>,
    return
  }
  func.func @transform_0(%arg0: i32) -> (i32, i32) {
    %c0_i32 = arith.constant 0 : i32
    %c0_i32_0 = arith.constant 0 : i32
    return %c0_i32, %arg0 : i32, i32
  }
  func.func @transform_1(%arg0: i32) -> (i32, i32) {
    %c0_i32 = arith.constant 0 : i32
    %c0_i32_0 = arith.constant 0 : i32
    return %c0_i32, %arg0 : i32, i32
  }
  func.func @transform_2(%arg0: i32) -> (i32, i32) {
    %c0_i32 = arith.constant 0 : i32
    %c0_i32_0 = arith.constant 0 : i32
    %c0_i32_1 = arith.constant 0 : i32
    return %c0_i32, %c0_i32_0 : i32, i32
  }
  func.func @transform_3(%arg0: i32) -> (i32, i32) {
    %c0_i32 = arith.constant 0 : i32
    %c0_i32_0 = arith.constant 0 : i32
    %c0_i32_1 = arith.constant 0 : i32
    return %c0_i32, %c0_i32_0 : i32, i32
  }
  func.func @transform_4(%arg0: i32) -> (i32, i32) {
    %c0_i32 = arith.constant 0 : i32
    %c0_i32_0 = arith.constant 0 : i32
    %c0_i32_1 = arith.constant 0 : i32
    return %c0_i32, %c0_i32_0 : i32, i32
  }
  func.func @transform_5(%arg0: i32) -> (i32, i32) {
    %c0_i32 = arith.constant 0 : i32
    %c0_i32_0 = arith.constant 0 : i32
    return %c0_i32, %arg0 : i32, i32
  }
  func.func @transform_6(%arg0: i32) -> (i32, i32) {
    %c0_i32 = arith.constant 0 : i32
    %c0_i32_0 = arith.constant 0 : i32
    return %c0_i32, %arg0 : i32, i32
  }
}

module attributes {stable_mosaic.version = 11 : i64} {
  func.func @_raw2outputs_kernel(%arg0: i32, %arg1: memref<3x16x128xf32, #tpu.memory_space<vmem>>, %arg2: memref<16x128xf32, #tpu.memory_space<vmem>>, %arg3: memref<16x128xf32, #tpu.memory_space<vmem>>, %arg4: memref<16x128xf32, #tpu.memory_space<vmem>>, %arg5: memref<16x128xf32, #tpu.memory_space<vmem>>, %arg6: memref<3x1xf32, #tpu.memory_space<vmem>>, %arg7: memref<3x128xf32, #tpu.memory_space<vmem>>, %arg8: memref<1x128xf32, #tpu.memory_space<vmem>>, %arg9: memref<1x128xf32, #tpu.memory_space<vmem>>) attributes {dimension_semantics = [#tpu.dimension_semantics<parallel>], iteration_bounds = array<i64: 1>, scalar_prefetch = 0 : i64, scratch_operands = 0 : i64, tpu.core_type = #tpu.core_type<tc>, window_params = [{transform_indices = @transform_0, window_bounds = array<i64: 3, 16, 128>}, {transform_indices = @transform_1, window_bounds = array<i64: 16, 128>}, {transform_indices = @transform_2, window_bounds = array<i64: 16, 128>}, {transform_indices = @transform_3, window_bounds = array<i64: 16, 128>}, {transform_indices = @transform_4, window_bounds = array<i64: 16, 128>}, {pipeline_mode = #tpu.pipeline_mode<synchronous>, transform_indices = @transform_5, window_bounds = array<i64: 3, 1>}, {transform_indices = @transform_6, window_bounds = array<i64: 3, 128>}, {transform_indices = @transform_7, window_bounds = array<i64: 1, 128>}, {transform_indices = @transform_8, window_bounds = array<i64: 1, 128>}]} {
    %c0 = arith.constant 0 : index
    %c0_0 = arith.constant 0 : index
    %c0_1 = arith.constant 0 : index
    %0 = vector.load %arg1[%c0, %c0_0, %c0_1] : memref<3x16x128xf32, #tpu.memory_space<vmem>>, vector<3x16x128xf32>
    %c0_2 = arith.constant 0 : index
    %c0_3 = arith.constant 0 : index
    %1 = vector.load %arg2[%c0_2, %c0_3] : memref<16x128xf32, #tpu.memory_space<vmem>>, vector<16x128xf32>
    %c0_4 = arith.constant 0 : index
    %c0_5 = arith.constant 0 : index
    %2 = vector.load %arg3[%c0_4, %c0_5] : memref<16x128xf32, #tpu.memory_space<vmem>>, vector<16x128xf32>
    %c0_6 = arith.constant 0 : index
    %c0_7 = arith.constant 0 : index
    %3 = vector.load %arg4[%c0_6, %c0_7] : memref<16x128xf32, #tpu.memory_space<vmem>>, vector<16x128xf32>
    %c0_8 = arith.constant 0 : index
    %c0_9 = arith.constant 0 : index
    %4 = vector.load %arg5[%c0_8, %c0_9] : memref<16x128xf32, #tpu.memory_space<vmem>>, vector<16x128xf32>
    %c0_10 = arith.constant 0 : index
    %c0_11 = arith.constant 0 : index
    %5 = vector.load %arg6[%c0_10, %c0_11] : memref<3x1xf32, #tpu.memory_space<vmem>>, vector<3x1xf32>
    %cst = arith.constant 0.00392156886 : f32
    %6 = vector.broadcast %cst : f32 to vector<3x1xf32>
    %7 = arith.mulf %5, %6 : vector<3x1xf32>
    %cst_12 = arith.constant 0.000000e+00 : f32
    %8 = vector.broadcast %cst_12 : f32 to vector<3x16x128xf32>
    %9 = arith.subf %8, %0 : vector<3x16x128xf32>
    %10 = math.exp %9 : vector<3x16x128xf32>
    %cst_13 = arith.constant 1.000000e+00 : f32
    %11 = vector.broadcast %cst_13 : f32 to vector<3x16x128xf32>
    %12 = arith.addf %11, %10 : vector<3x16x128xf32>
    %cst_14 = arith.constant 1.000000e+00 : f32
    %13 = vector.broadcast %cst_14 : f32 to vector<3x16x128xf32>
    %14 = arith.divf %13, %12 : vector<3x16x128xf32>
    %cst_15 = arith.constant 0.000000e+00 : f32
    %15 = vector.broadcast %cst_15 : f32 to vector<16x128xf32>
    %16 = arith.maximumf %1, %15 : vector<16x128xf32>
    %17 = math.absf %1 : vector<16x128xf32>
    %cst_16 = arith.constant 0.000000e+00 : f32
    %18 = vector.broadcast %cst_16 : f32 to vector<16x128xf32>
    %19 = arith.subf %18, %17 : vector<16x128xf32>
    %20 = math.exp %19 : vector<16x128xf32>
    %cst_17 = arith.constant 1.000000e+00 : f32
    %21 = vector.broadcast %cst_17 : f32 to vector<16x128xf32>
    %22 = arith.addf %21, %20 : vector<16x128xf32>
    %23 = math.log %22 : vector<16x128xf32>
    %24 = arith.addf %16, %23 : vector<16x128xf32>
    %cst_18 = arith.constant 0.000000e+00 : f32
    %25 = vector.broadcast %cst_18 : f32 to vector<16x128xf32>
    %26 = arith.subf %25, %24 : vector<16x128xf32>
    %27 = arith.mulf %26, %4 : vector<16x128xf32>
    %28 = math.exp %27 : vector<16x128xf32>
    %cst_19 = arith.constant 1.000000e+00 : f32
    %29 = vector.broadcast %cst_19 : f32 to vector<16x128xf32>
    %30 = arith.subf %29, %28 : vector<16x128xf32>
    %31 = arith.mulf %30, %2 : vector<16x128xf32>
    %32 = tpu.iota {dimensions = array<i32: 0>} : vector<16x16xi32>
    %33 = tpu.iota {dimensions = array<i32: 1>} : vector<16x16xi32>
    %34 = arith.cmpi slt, %33, %32 : vector<16x16xi32>
    %35 = arith.extui %34 : vector<16x16xi1> to vector<16x16xi32>
    %36 = arith.sitofp %35 : vector<16x16xi32> to vector<16x16xf32>
    %cst_20 = arith.constant 1.000000e+00 : f32
    %37 = vector.broadcast %cst_20 : f32 to vector<16x128xf32>
    %38 = arith.subf %37, %31 : vector<16x128xf32>
    %cst_21 = arith.constant 1.000000e-10 : f32
    %39 = vector.broadcast %cst_21 : f32 to vector<16x128xf32>
    %40 = arith.addf %38, %39 : vector<16x128xf32>
    %41 = math.log %40 : vector<16x128xf32>
    %cst_22 = arith.constant dense<0.000000e+00> : vector<16x128xf32>
    %42 = tpu.matmul %36, %41, %cst_22 {dimension_numbers = #tpu.dot_dimension_numbers<[1], [0], [0], [1], [0, 0, 1, 1], [], []>} : vector<16x16xf32>, vector<16x128xf32>, vector<16x128xf32> -> vector<16x128xf32>
    %43 = math.exp %42 : vector<16x128xf32>
    %44 = arith.mulf %31, %43 : vector<16x128xf32>
    %cst_23 = arith.constant dense<0.000000e+00> : vector<128xf32>
    %45 = vector.multi_reduction <add>, %44, %cst_23 [0] : vector<16x128xf32> to vector<128xf32>
    %46 = vector.shape_cast %45 : vector<128xf32> to vector<1x128xf32>
    %47 = arith.mulf %44, %3 : vector<16x128xf32>
    %cst_24 = arith.constant dense<0.000000e+00> : vector<128xf32>
    %48 = vector.multi_reduction <add>, %47, %cst_24 [0] : vector<16x128xf32> to vector<128xf32>
    %49 = vector.shape_cast %48 : vector<128xf32> to vector<1x128xf32>
    %50 = vector.shape_cast %44 : vector<16x128xf32> to vector<1x16x128xf32>
    %51 = vector.shape_cast %7 : vector<3x1xf32> to vector<3x1x1xf32>
    %52 = vector.broadcast %51 : vector<3x1x1xf32> to vector<3x16x128xf32>
    %53 = arith.subf %14, %52 : vector<3x16x128xf32>
    %54 = vector.broadcast %50 : vector<1x16x128xf32> to vector<3x16x128xf32>
    %55 = arith.mulf %54, %53 : vector<3x16x128xf32>
    %cst_25 = arith.constant dense<0.000000e+00> : vector<3x128xf32>
    %56 = vector.multi_reduction <add>, %55, %cst_25 [1] : vector<3x16x128xf32> to vector<3x128xf32>
    %57 = vector.broadcast %7 : vector<3x1xf32> to vector<3x128xf32>
    %58 = arith.addf %56, %57 : vector<3x128xf32>
    %c0_26 = arith.constant 0 : index
    %c0_27 = arith.constant 0 : index
    %59 = vector.load %arg7[%c0_26, %c0_27] : memref<3x128xf32, #tpu.memory_space<vmem>>, vector<3x128xf32>
    tpu.vector_store %arg7[%c0_26, %c0_27], %58 {strides = array<i32>} : memref<3x128xf32, #tpu.memory_space<vmem>>, vector<3x128xf32>,
    %c0_28 = arith.constant 0 : index
    %c0_29 = arith.constant 0 : index
    %60 = vector.load %arg8[%c0_28, %c0_29] : memref<1x128xf32, #tpu.memory_space<vmem>>, vector<1x128xf32>
    tpu.vector_store %arg8[%c0_28, %c0_29], %46 {strides = array<i32>} : memref<1x128xf32, #tpu.memory_space<vmem>>, vector<1x128xf32>,
    %c0_30 = arith.constant 0 : index
    %c0_31 = arith.constant 0 : index
    %61 = vector.load %arg9[%c0_30, %c0_31] : memref<1x128xf32, #tpu.memory_space<vmem>>, vector<1x128xf32>
    tpu.vector_store %arg9[%c0_30, %c0_31], %49 {strides = array<i32>} : memref<1x128xf32, #tpu.memory_space<vmem>>, vector<1x128xf32>,
    return
  }
  func.func @transform_0(%arg0: i32) -> (i32, i32, i32) {
    %c0_i32 = arith.constant 0 : i32
    %c0_i32_0 = arith.constant 0 : i32
    %c0_i32_1 = arith.constant 0 : i32
    return %c0_i32, %c0_i32_0, %arg0 : i32, i32, i32
  }
  func.func @transform_1(%arg0: i32) -> (i32, i32) {
    %c0_i32 = arith.constant 0 : i32
    %c0_i32_0 = arith.constant 0 : i32
    return %c0_i32, %arg0 : i32, i32
  }
  func.func @transform_2(%arg0: i32) -> (i32, i32) {
    %c0_i32 = arith.constant 0 : i32
    %c0_i32_0 = arith.constant 0 : i32
    return %c0_i32, %arg0 : i32, i32
  }
  func.func @transform_3(%arg0: i32) -> (i32, i32) {
    %c0_i32 = arith.constant 0 : i32
    %c0_i32_0 = arith.constant 0 : i32
    return %c0_i32, %arg0 : i32, i32
  }
  func.func @transform_4(%arg0: i32) -> (i32, i32) {
    %c0_i32 = arith.constant 0 : i32
    %c0_i32_0 = arith.constant 0 : i32
    return %c0_i32, %arg0 : i32, i32
  }
  func.func @transform_5(%arg0: i32) -> (i32, i32) {
    %c0_i32 = arith.constant 0 : i32
    %c0_i32_0 = arith.constant 0 : i32
    %c0_i32_1 = arith.constant 0 : i32
    return %c0_i32, %c0_i32_0 : i32, i32
  }
  func.func @transform_6(%arg0: i32) -> (i32, i32) {
    %c0_i32 = arith.constant 0 : i32
    %c0_i32_0 = arith.constant 0 : i32
    return %c0_i32, %arg0 : i32, i32
  }
  func.func @transform_7(%arg0: i32) -> (i32, i32) {
    %c0_i32 = arith.constant 0 : i32
    %c0_i32_0 = arith.constant 0 : i32
    return %c0_i32, %arg0 : i32, i32
  }
  func.func @transform_8(%arg0: i32) -> (i32, i32) {
    %c0_i32 = arith.constant 0 : i32
    %c0_i32_0 = arith.constant 0 : i32
    return %c0_i32, %arg0 : i32, i32
  }
}

</mosaic_0001>

<bundles_post_ra>
// kernel: custom-call.11
= control target key start
LH: loop header
LB: loop body
LE: loop exit
PB: predicated region body
PF: predicated region fallthrough
CT: control target
= control target key end

     0   :  { %5 = vsyncpa [#allocation2], 0  ;;  %s942_s0 = inlined_call_operand.hbm [shape: f32[4,4,4], index: 0, kind: input, shape index: {}]   ;;  %s943_s1 = inlined_call_operand.vmem [shape: f32[4,4,4], index: 1, kind: output, shape index: {0}]   ;;  %s944_s2 = inlined_call_operand.hbm [shape: s32[4,4], index: 2, kind: output, shape index: {1}]   ;;  %s945_s3 = inlined_call_operand.vmem [shape: s32[4,4], index: 3, kind: output, shape index: {2}]  }
   0x1   :  { %7 = vsyncpa [#allocation2 + $0x1], 0 }
   0x2   :  { %8 = vsyncpa [#allocation3], 0 }
   0x3   :  { %10 = vsyncpa [#allocation3 + $0x1], 0  ;;  %s735_s12 = smov 0   ;;  %s737_s13 = smov 0  }
   0x4   :  { %s739_s14 = smov 0   ;;  %s741_s15 = smov 0  }
   0x5 LB: > { %s756_s16 = sadd.s32 4294967295, %s706_s15   ;;  %s536_s17 = sadd.s32 4294967294, %s706_s15   ;;  %s706_s15 = sphi %s741_s15, %s956_s15   ;;  %s702_s14 = sphi %s739_s14, %s955_s14   ;;  %s698_s13 = sphi %s737_s13, %s954_s13   ;;  %s694_s12 = sphi %s735_s12, %s953_s12  }
   0x6   : > { %s760_s18 = sadd.s32 1, %s706_s15   ;;  %s20_s19 = sshrl.u32 %s706_s15, 3 }
   0x7   : > { %s21_s20 = sshrl.u32 %s760_s18, 3  ;;  %s25_s21 = sadd.s32 1, %s702_s14 }
   0x8   : > { %s22_s22 = ssub.s32 %s20_s19, %s21_s20  ;;  %p35_p0 = scmp.ne.s32.totalorder %s702_s14, %s698_s13 }
   0x9   : > { %p23_p1 = scmp.eq.s32.totalorder %s22_s22, 0  ;;  %p36_p2 = scmp.eq.s32.totalorder %s756_s16, 3 }
   0xa   : > { %p41_p3 = scmp.ne.s32.totalorder %s698_s13, %s694_s12  ;;  %p42_p4 = scmp.eq.s32.totalorder %s536_s17, 3 }
   0xb   : > { %s771_s23 = scalar_select %p23_p1, %s702_s14, %s25_s21  }
   0xc   : > { %p773_p5 = por %p36_p2, %p35_p0  ;;  %p777_p6 = por %p42_p4, %p41_p3 }
   0xd   : > { %p565_p7 = scmp.lt.s32.totalorder %s706_s15, 4  ;;  %s87_s26 = sand.u32 1, %s706_s15  }
   0xe   : > { %s948_s25 = scalar_select %p777_p6, 1, 0 }
   0xf   : > { %s540_s27 = sshll.u32 %s706_s15, 6  ;;  %s539_s28 = sshll.u32 %s87_s26, 2 }
  0x10   : > { %s787_s4 = scalar_lea.hbm %s942_s0, %s540_s27  ;;  %s91_s5 = scalar_lea.vmem [#allocation1], %s539_s28 }
  0x11   : > { %s98_s6 = sshll.u32 %s91_s5, 4  ;;  %s88_s7 = scalar_lea.sflag [#allocation2], %s87_s26  ;;  %s790_s6 = int_to_ptr.vmem [resolvable:$true] %s98_s6 }
  0x12   : > { %s610_s8 = scalar_lea.hbm %s787_s4, 64  ;;  %s614_s11 = scalar_lea.hbm %s942_s0, 256 }
  0x13   : > { %p611_p10 = scmp.ne.s32.totalorder %s787_s4, %s610_s8  ;;  %p615_p13 = scmp.lt.u32.totalorder %s787_s4, %s942_s0 }
  0x14   : > { %p616_p0 = scmp.lt.u32.totalorder %s614_s11, %s610_s8  ;;  %p618_p2 = scmp.lt.u32.totalorder %s610_s8, %s787_s4 }
  0x15   : > { %p612_p11 = pnand %p611_p10, %p565_p7 }
  0x16   : > { %p617_p1 = por %p616_p0, %p615_p13 }
  0x17   : > { %p613_p12 = pneg %p612_p11 }
  0x18   : > { %p619_p3 = por %p618_p2, %p617_p1 }
  0x1a   : > { %p620_p4 = pnand %p619_p3, %p613_p12 }
  0x1c   : > { %623 = shalt.err (!%p620_p4)
}
  0x1d   : > { %s624_s20 = scalar_lea.vmem %s790_s6, 64  ;;  %s712_s21 = smov [#allocation1]  }
  0x1e   : > { %p625_p10 = scmp.ne.s32.totalorder %s790_s6, %s624_s20  ;;  %s628_s22 = sshll.u32 %s712_s21, 4  ;;  %s629_s22 = int_to_ptr.vmem [resolvable:$false] %s628_s22 }
  0x1f   : > { %s630_s26 = scalar_lea.vmem %s629_s22, 128  ;;  %p631_p9 = scmp.lt.s32.totalorder %s790_s6, %s629_s22 }
  0x20   : > { %p626_p11 = pnand %p625_p10, %p565_p7  ;;  %p632_p6 = scmp.lt.s32.totalorder %s630_s26, %s624_s20 }
  0x22   : > { %p627_p8 = pneg %p626_p11  ;;  %p633_p13 = por %p632_p6, %p631_p9 }
  0x24   : > { %p634_p0 = pnand %p633_p13, %p627_p8 }
  0x26   : > { %637 = shalt.err (!%p634_p0)
}
  0x27   : > { %558 = dma.hbm_to_vmem [thread:$0]  (%p565_p7), %s787_s4, 64, %s790_s6, %s88_s7  }
  0x28   : > { %p949_p12 = scmp.lt.s32.totalorder %s706_s15, 5  ;;  %p950_p1 = scmp.ge.s32.totalorder %s706_s15, 1 }
  0x2a   : > { %p104_p2 = pnand %p950_p1, %p949_p12 }
  0x2c   : > { %107 = sbr.rel (%p104_p2) target bundleno = 474 (0x1da), region = 20 }
  0x33   : > { %s109_s27 = sand.u32 1, %s756_s16  }
  0x34   : > { %s110_s28 = scalar_lea.sflag [#allocation2], %s109_s27 }
  0x35   : > { %686 = dma.done.wait %s110_s28, 64  }
  0x36   : > { %687 = vsyncadd %s110_s28, 4294967232  ;;  %s819_s29 = sshll.u32 %s109_s27, 2  ;;  %s145_s30 = sand.u32 7, %s756_s16   ;;  %v150_v0 = vlaneseq  ;;  %v713_v2 = vmov 0  }
  0x37   : > { %s825_s4 = scalar_lea.vmem [#allocation6], %s145_s30  ;;  %s128_s5 = sand.u32 1, %s698_s13  }
  0x38   : > { %v823_v1 = vshrl.u32 %v150_v0, 7  ;;  %149 = vst [vmem:[%s825_s4] sm:$0x1] %v713_v2  ;;  %s832_s6 = sshll.u32 %s128_s5, 2  ;;  %s119_s7 = scalar_lea.vmem [#allocation1], %s819_s29 }
  0x39   : > { %v139_v3 = vld [vmem:[%s119_s7] sm:$0xf]  ;;  %s123_s8 = scalar_lea.vmem [#allocation5], %s819_s29  ;;  %s130_s9 = scalar_lea.vmem [#allocation7], %s832_s6 }
  0x3a   : > { %154 = vst [vmem:[#allocation10] sm:$0xff] %v823_v1  ;;  %140 = vst [vmem:[#allocation0] sm:$0xf] %v139_v3  ;;  %s136_s10 = scalar_lea.vmem [#allocation9], %s832_s6  ;;  %s838_s11 = scalar_lea.vmem [#allocation8], %s145_s30 }
  0x3b   : > { %s840_s17 = smov 0  }
  0x41   : > { %v143_v4 = vld [vmem:[#allocation0] sm:$0xff] }
  0x42   : > { %144 = vst [vmem:[#allocation4] sm:$0xff] %v143_v4 }
  0x43 LB: >> { %vm170_vm0 = vcmp.lt.s32.totalorder %v823_v1, 4  ;;  %v847_v7 = vstv %s710_s17  ;;  %s211_s19 = ssub.s32 128, %s710_s17  ;;  %v217_v37 = vand.u32 127, %v150_v0  ;;  %v220_v39 = vld [vmem:[%s825_s4] ss:$0 sm:$0xff]  ;;  %s223_s20 = scalar_lea.vmem [#allocation4], %s710_s17  ;;  %s710_s17 = sphi %s840_s17, %s160_s17  }
  0x44   : >> { %vm169_vm1 = vcmp.ge.s32.totalorder %v823_v1, %v847_v7  ;;  %s229_s22 = scalar_lea.vmem [#allocation10], %s710_s17  ;;  %vm249_vm15 = vcmp.gt.s32.totalorder %v823_v1, %v847_v7  ;;  %s160_s17 = sadd.s32 1, %s710_s17  }
  0x45   : >> { %vm171_vm3 = vmand %vm169_vm1, %vm170_vm0  ;;  %vm241_vm12 = vcmp.gt.s32.totalorder %v217_v37, %v847_v7  ;;  %vm218_vm13 = vcmp.eq.s32.totalorder %v217_v37, %v847_v7  ;;  %v231_v41 = vld [vmem:[%s229_s22] ss:$0 sm:$0xff]  ;;  %p157_p6 = scmp.ge.s32.totalorder %s160_s17, 4  }
  0x46   : >> { %vm253_vm1 = vmand %vm249_vm15, %vm218_vm13  ;;  %s946_s28 = sshrl.u32 (%p157_p6), %s756_s16, 3  ;;  %s550_s30 = sshll.u32 (%p157_p6), %s756_s16, 2 }
  0x47   : > { %s551_s7 = sshll.u32 (%p157_p6), %s946_s28, 6 }
  0x49   : >> { %v165_v5 = vld [vmem:[#allocation4] sm:$0xff]  ;;  %v225_v40 = vld [vmem:[%s223_s20] ss:$0 sm:$0xff] }
  0x4a   : >> { %v166_v6 = vand.u32 2147483647, %v165_v5 }
  0x4c   : >> { %vm546_vm2 = vcmp.gt.f32.partialorder %v166_v6, -inf }
  0x4d   : >> { %vm173_vm4 = vmand %vm171_vm3, %vm546_vm2 }
  0x4e   : >> { %v174_v8 = vsel %vm173_vm4, %v823_v1, %v847_v7  ;;  %v175_v9 = vsel %vm173_vm4, %v166_v6, -inf }
  0x4f   : >> { %v176_v10 = vrot.slane %v175_v9, 1  ;;  %v177_v11 = vrot.slane %v174_v8, 1 }
  0x51   : >> { %vm178_vm5 = vcmp.ge.f32.partialorder %v176_v10, %v175_v9  ;;  %v181_v12 = vrot.slane %v176_v10, 1  ;;  %v182_v13 = vrot.slane %v177_v11, 1 }
  0x52   : >> { %v179_v14 = vsel %vm178_vm5, %v176_v10, %v175_v9  ;;  %v180_v15 = vsel %vm178_vm5, %v177_v11, %v174_v8 }
  0x53   : >> { %vm183_vm6 = vcmp.ge.f32.partialorder %v181_v12, %v179_v14  ;;  %v186_v16 = vrot.slane %v181_v12, 1  ;;  %v187_v17 = vrot.slane %v182_v13, 1 }
  0x54   : >> { %v184_v18 = vsel %vm183_vm6, %v181_v12, %v179_v14  ;;  %v185_v19 = vsel %vm183_vm6, %v182_v13, %v180_v15 }
  0x55   : >> { %vm188_vm7 = vcmp.ge.f32.partialorder %v186_v16, %v184_v18  ;;  %v191_v20 = vrot.slane %v186_v16, 1  ;;  %v192_v21 = vrot.slane %v187_v17, 1 }
  0x56   : >> { %v189_v22 = vsel %vm188_vm7, %v186_v16, %v184_v18  ;;  %v190_v23 = vsel %vm188_vm7, %v187_v17, %v185_v19 }
  0x57   : >> { %vm193_vm8 = vcmp.ge.f32.partialorder %v191_v20, %v189_v22  ;;  %v196_v24 = vrot.slane %v191_v20, 1  ;;  %v197_v25 = vrot.slane %v192_v21, 1 }
  0x58   : >> { %v194_v26 = vsel %vm193_vm8, %v191_v20, %v189_v22  ;;  %v195_v27 = vsel %vm193_vm8, %v192_v21, %v190_v23 }
  0x59   : >> { %vm198_vm9 = vcmp.ge.f32.partialorder %v196_v24, %v194_v26  ;;  %v201_v28 = vrot.slane %v196_v24, 1  ;;  %v202_v29 = vrot.slane %v197_v25, 1 }
  0x5a   : >> { %v199_v30 = vsel %vm198_vm9, %v196_v24, %v194_v26  ;;  %v200_v31 = vsel %vm198_vm9, %v197_v25, %v195_v27 }
  0x5b   : >> { %vm203_vm10 = vcmp.ge.f32.partialorder %v201_v28, %v199_v30  ;;  %v206_v32 = vrot.slane %v201_v28, 1  ;;  %v207_v33 = vrot.slane %v202_v29, 1 }
  0x5c   : >> { %v204_v34 = vsel %vm203_vm10, %v201_v28, %v199_v30  ;;  %v205_v35 = vsel %vm203_vm10, %v202_v29, %v200_v31 }
  0x5d   : >> { %vm208_vm11 = vcmp.ge.f32.partialorder %v206_v32, %v204_v34 }
  0x5e   : >> { %v210_v36 = vsel %vm208_vm11, %v207_v33, %v205_v35 }
  0x5f   : >> { %212 = vrot.lane.b32.xlu0 %v210_v36, %s211_s19  ;;  %s341_s19 = scalar_lea.vmem (%p157_p6), %s943_s1, %s550_s30 }
  0xd1   : >> { %v213_v38 = vpop.permute.xlu0 %212 }
  0xd2   : >> { %555 = vpush %v213_v38 }
 0x103   : >> { %s556_s21 = spop %555 }
 0x104   : >> { %v219_v42 = vstv %s556_s21  ;;  %s224_s26 = scalar_lea.vmem [#allocation4], %s556_s21  ;;  %s230_s27 = scalar_lea.vmem [#allocation10], %s556_s21 }
 0x105   : >> { %v226_v43 = vld [vmem:[%s224_s26] ss:$0 sm:$0xff]  ;;  %v221_v45 = vsel %vm218_vm13, %v219_v42, %v220_v39 }
 0x106   : >> { %v232_v44 = vld [vmem:[%s230_s27] ss:$0 sm:$0xff]  ;;  %227 = vst [vmem:[%s224_s26] sm:$0x1] %v225_v40  ;;  %vm235_vm14 = vcmp.ne.f32.partialorder %v226_v43, 0.0  ;;  %222 = vst [vmem:[%s825_s4] sm:$0x1] %v221_v45  ;;  %v242_v52 = vsel %vm241_vm12, %v226_v43, 0.0 }
 0x107   : >> { %233 = vst [vmem:[%s230_s27] sm:$0x1] %v231_v41  ;;  %228 = vst [vmem:[%s223_s20] sm:$0x1] %v226_v43  ;;  %s383_s26 = sshll.u32 (%p157_p6), %s130_s9, 4  ;;  %s332_s27 = scalar_lea.sflag (%p157_p6), [#allocation3], %s128_s5  ;;  %s384_s26 = int_to_ptr.vmem [resolvable:$true] %s383_s26 }
 0x108   : >> { %234 = vst [vmem:[%s229_s22] sm:$0x1] %v232_v44  ;;  %vm236_vm0 = vmand %vm218_vm13, %vm235_vm14  ;;  %s890_s22 = scalar_lea.hbm (%p157_p6), %s944_s2, %s551_s7  ;;  %s638_s28 = scalar_lea.vmem (%p157_p6), %s384_s26, 64 }
 0x109   : >> { %v237_v46 = vsel %vm236_vm0, %v226_v43, 1.0  ;;  %p639_p7 = scmp.ne.s32.totalorder (%p157_p6), %s384_s26, %s638_s28  ;;  %s714_s4 = smov (%p157_p6), [#allocation7]  }
 0x10a   : >> { %v250_v47 = vsel %vm249_vm15, %v237_v46, 1.0  ;;  %s642_s30 = sshll.u32 (%p157_p6), %s714_s4, 4  ;;  %s643_s30 = int_to_ptr.vmem [resolvable:$false] %s642_s30 }
 0x10b   : >> { %608 = vrcp.f32 %v250_v47  ;;  %p640_p8 = pnand (%p157_p6), %p639_p7, %p773_p5  ;;  %s644_s29 = scalar_lea.vmem (%p157_p6), %s643_s30, 128 }
 0x10c   : > { %p645_p3 = scmp.lt.s32.totalorder (%p157_p6), %s384_s26, %s643_s30  ;;  %p646_p4 = scmp.lt.s32.totalorder (%p157_p6), %s644_s29, %s638_s28 }
 0x10d   : > { %v318_v58 = vld [vmem:[#allocation6] sm:$0xf] (%p157_p6)  ;;  %p641_p9 = pneg (%p157_p6), %p640_p8 }
 0x10e   : >> { %v246_v49 = vld [vmem:[#allocation4] sm:$0xff]  ;;  %320 = vst [vmem:[%s130_s9] sm:$0xf] (%p157_p6), %v318_v58  ;;  %p647_p10 = por (%p157_p6), %p646_p4, %p645_p3 }
 0x10f   : > { %v260_v56 = vld [vmem:[#allocation10] sm:$0xff] (%p157_p6) }
 0x110   : > { %p648_p11 = pnand (%p157_p6), %p647_p10, %p641_p9 }
 0x115   : >> { %v609_v48 = vpop.eup %608 }
 0x116   : >> { %v252_v50 = vmul.f32 %v609_v48, %v246_v49 }
 0x118   : >> { %v254_v51 = vsel %vm253_vm1, %v252_v50, 0.0 }
 0x119   : >> { %255 = vadd.xlane.f32.xlu0 %v254_v51 }
 0x146   : > { %276 = vxpose.xlu0.b32.start.end [1/1] (short) (narrow) (%p157_p6), %v260_v56, 8 }
 0x1a5   : > { %159 = sbr.rel (!%p157_p6) target bundleno = 67 (0x43), region = 173 }
 0x1a6   : >> { %v256_v53 = vpop.xlane.xlu0 %255 }
 0x1a7   : >> { %v257_v54 = vmul.f32 %v256_v53, %v242_v52 }
 0x1a9   : >> { %v258_v55 = vsub.f32 %v252_v50, %v257_v54 }
 0x1ab   : >> { %259 = vst [vmem:[#allocation4] sm:$0xff] %v258_v55 }
 0x1b2   : > { %v312_v57 = vld [vmem:[#allocation4] sm:$0xf] }
 0x1b3   : > { %314 = vst [vmem:[%s123_s8] sm:$0xf] %v312_v57 }
 0x1ba   : > { %v357_v59 = vld [vmem:[%s123_s8] sm:$0xf] }
 0x1bb   : > { %358 = vst [vmem:[%s341_s19] sm:$0xf] %v357_v59 }
 0x1bc   : > { %651 = shalt.err (!%p648_p11)
}
 0x1bd   : > { %s652_s5 = scalar_lea.hbm %s890_s22, 64  ;;  %s656_s7 = scalar_lea.hbm %s944_s2, 64 }
 0x1be   : > { %p653_p13 = scmp.ne.s32.totalorder %s890_s22, %s652_s5  ;;  %p657_p1 = scmp.lt.u32.totalorder %s890_s22, %s944_s2 }
 0x1bf   : > { %p658_p2 = scmp.lt.u32.totalorder %s656_s7, %s652_s5  ;;  %p660_p7 = scmp.lt.u32.totalorder %s652_s5, %s890_s22 }
 0x1c0   : > { %p654_p0 = pnand %p653_p13, %p773_p5 }
 0x1c1   : > { %p659_p6 = por %p658_p2, %p657_p1 }
 0x1c2   : > { %p655_p12 = pneg %p654_p0 }
 0x1c3   : > { %p661_p8 = por %p660_p7, %p659_p6 }
 0x1c5   : > { %p662_p9 = pnand %p661_p8, %p655_p12 }
 0x1c7   : > { %665 = shalt.err (!%p662_p9)
}
 0x1c8   : > { %559 = dma.vmem_to_hbm [thread:$0]  (%p773_p5), %s384_s26, 64, %s890_s22, %s332_s27   ;;  %v292_v60 = vpop.trf.xlu0 }
 0x1c9   : > { %308 = vst [vmem:[%s838_s11] sm:$0x1] %v292_v60  ;;  %s951_s28 = sshrl.u32 (%p773_p5), %s756_s16, 3 }
 0x1ca   : > { %s552_s20 = sshll.u32 (%p773_p5), %s951_s28, 2 }
 0x1cb   : > { %389 = sbr.rel (!%p773_p5) target bundleno = 474 (0x1da), region = 66  ;;  %s392_s30 = scalar_lea.vmem (%p773_p5), %s945_s3, %s552_s20 }
 0x1d0   : > { %v324_v61 = vld [vmem:[#allocation8] sm:$0xf] }
 0x1d1   : > { %326 = vst [vmem:[%s136_s10] sm:$0xf] %v324_v61 }
 0x1d8   : > { %v408_v62 = vld [vmem:[%s136_s10] sm:$0xf] }
 0x1d9   : > { %409 = vst [vmem:[%s392_s30] sm:$0xf] %v408_v62 }
 0x1da PF: > { %p566_p3 = scmp.ge.s32.totalorder %s706_s15, 2  ;;  %s436_s11 = sand.u32 1, %s694_s12  }
 0x1db   : > { %p952_p4 = scmp.ne.s32.totalorder %s948_s25, 0  ;;  %s437_s24 = scalar_lea.sflag [#allocation3], %s436_s11 }
 0x1dd   : > { %p562_p5 = pnand %p566_p3, %p952_p4 }
 0x1df   : > { %689 = dma.done.wait (!%p562_p5), %s437_s24, 64  }
 0x1e0   : > { %691 = vsyncadd (!%p562_p5), %s437_s24, 4294967232  ;;  %p13_p10 = scmp.ge.s32.totalorder %s760_s18, 6   ;;  %s953_s12 = smov %s698_s13 }
 0x1e1   : > { %s954_s13 = smov %s702_s14  ;;  %s955_s14 = smov %s771_s23 }
 0x1e2   : > { %s956_s15 = smov %s760_s18  ;;  %15 = sbr.rel (!%p13_p10) target bundleno = 5 (0x5), region = 184 }
 0x1e9   :  { %449 = vsyncpa [#allocation2], 1 }
 0x1ea   :  { %451 = vsyncpa [#allocation2 + $0x1], 1 }
 0x1eb   :  { %452 = vsyncpa [#allocation3], 1 }
 0x1ec   :  { %454 = vsyncpa [#allocation3 + $0x1], 1 }

// kernel: custom-call.13
= control target key start
LH: loop header
LB: loop body
LE: loop exit
PB: predicated region body
PF: predicated region fallthrough
CT: control target
= control target key end

     0   :  { %s353_s6 = smov 0   ;;  %s355_s7 = smov 0   ;;  %s400_s0 = inlined_call_operand.vmem [shape: f32[4,1,4,4], index: 0, kind: input, shape index: {}]   ;;  %s401_s1 = inlined_call_operand.vmem [shape: f32[4,1,4,4], index: 1, kind: output, shape index: {}]  }
   0x1   :  { %s357_s8 = smov 0  }
   0x2 LB: > { %s279_s9 = sadd.s32 4294967295, %s340_s8   ;;  %s33_s10 = sadd.s32 1, %s336_s7  ;;  %s340_s8 = sphi %s357_s8, %s7_s8   ;;  %s336_s7 = sphi %s355_s7, %s403_s7   ;;  %s332_s6 = sphi %s353_s6, %s402_s6  }
   0x3   : > { %p35_p0 = scmp.ge.s32.totalorder %s33_s10, 4  ;;  %p281_p1 = scmp.ge.s32.totalorder %s340_s8, 4 }
   0x4   : > { %s49_s11 = sand.u32 (!%p281_p1), 1, %s340_s8   ;;  %s283_s12 = sshll.u32 (!%p281_p1), %s336_s7, 2 }
   0x5   : > { %s405_s10 = smov (%p35_p0, %s33_s10), 0  ;;  %47 = sbr.rel (%p281_p1) target bundleno = 12 (0xc), region = 16 }
   0x6   : > { %s282_s13 = sshll.u32 (!%p281_p1), %s49_s11, 2  ;;  %s56_s16 = scalar_lea.vmem (!%p281_p1), %s400_s0, %s283_s12 }
   0x7   : > { %v72_v0 = vld [vmem:[%s56_s16] sm:$0xf] (!%p281_p1)  ;;  %s51_s17 = scalar_lea.vmem (!%p281_p1), [#allocation1], %s282_s13 }
   0x8   : > { %73 = vst [vmem:[%s51_s17] sm:$0xf] (!%p281_p1), %v72_v0 }
   0xc PF: > { %p284_p2 = scmp.ge.s32.totalorder %s340_s8, 1  ;;  %p89_p3 = scmp.lt.s32.totalorder %s340_s8, 5 }
   0xe   : > { %p90_p4 = pnand %p284_p2, %p89_p3 }
  0x10   : > { %93 = sbr.rel (%p90_p4) target bundleno = 656 (0x290), region = 50 }
  0x17   : > { %s380_s18 = sand.u32 1, %s279_s9   ;;  %v111_v1 = vlaneseq  ;;  %v342_v11 = vmov -1.0   ;;  %s288_s22 = sshll.u32 %s332_s6, 2 }
  0x18   : > { %s285_s19 = sshll.u32 %s380_s18, 2  ;;  %s188_s25 = scalar_lea.vmem %s401_s1, %s288_s22 }
  0x19   : > { %s102_s20 = scalar_lea.vmem [#allocation1], %s285_s19  ;;  %v112_v3 = vand.u32 127, %v111_v1  ;;  %v115_v4 = vshrl.u32 %v111_v1, 7  ;;  %s106_s21 = scalar_lea.vmem [#allocation3], %s285_s19 }
  0x1a   : > { %v109_v2 = vld [vmem:[%s102_s20] sm:$0xf] }
  0x1b   : > { %110 = vst [vmem:[#allocation0] sm:$0xf] %v109_v2  ;;  %vm113_vm0 = vcmp.lt.s32.totalorder %v112_v3, 4  ;;  %vm122_vm1 = vcmp.ge.s32.totalorder %v115_v4, %v112_v3  ;;  %vm117_vm2 = vcmp.eq.s32.totalorder %v115_v4, %v112_v3  ;;  %vm136_vm4 = vcmp.eq.s32.totalorder %v112_v3, 0 }
  0x1c   : > { %vm123_vm3 = vmand %vm122_vm1, %vm113_vm0  ;;  %vm133_vm5 = vcmp.eq.s32.totalorder %v112_v3, %v115_v4  ;;  %v137_v12 = vsel %vm136_vm4, 1.0, %v342_v11  ;;  %vm144_vm6 = vcmp.eq.s32.totalorder %v112_v3, 1  ;;  %vm154_vm7 = vcmp.eq.s32.totalorder %v112_v3, 2 }
  0x1d   : > { %v138_v13 = vsel %vm133_vm5, %v137_v12, 0.0  ;;  %vm164_vm8 = vcmp.eq.s32.totalorder %v112_v3, 3 }
  0x22   : > { %v118_v5 = vld [vmem:[#allocation0] sm:$0xff] }
  0x23   : > { %v119_v6 = vsel %vm117_vm2, %v118_v5, 0.0  ;;  %v124_v7 = vsel %vm123_vm3, %v118_v5, 0.0 }
  0x24   : > { %120 = vadd.xlane.f32.xlu0 %v119_v6 }
  0xb1   : > { %v121_v8 = vpop.xlane.xlu0 %120 }
  0xb2   : > { %316 = vrcp.f32 %v121_v8  ;;  %vm171_vm9 = vweird.f32 %v121_v8 }
  0xbc   : > { %v317_v9 = vpop.eup %316 }
  0xbd   : > { %v126_v10 = vmul.f32 %v317_v9, %v124_v7 }
  0xbf   : > { %127 = vst [vmem:[#allocation4] sm:$0xff] %v126_v10 }
  0xc6   : > { %v140_v14 = vld [vmem:[#allocation4 + $0x1] ss:$0 sm:$0xff]  ;;  %v150_v17 = vld [vmem:[#allocation4 + $0x2] ss:$0 sm:$0xff]  ;;  %v160_v22 = vld [vmem:[#allocation4 + $0x3] ss:$0 sm:$0xff] }
  0xc7   : > { %v141_v15 = vxor.u32 2147483648, %v140_v14  ;;  %v151_v19 = vxor.u32 2147483648, %v150_v17  ;;  %v161_v24 = vxor.u32 2147483648, %v160_v22 }
  0xc9   : > { %v145_v16 = vmul.f32 %v141_v15, %v138_v13 }
  0xcb   : > { %146 = vadd.xlane.f32.xlu0 %v145_v16 }
 0x158   : > { %v147_v18 = vpop.xlane.xlu0 %146 }
 0x159   : > { %v148_v20 = vsel %vm144_vm6, %v147_v18, %v138_v13 }
 0x15a   : > { %v155_v21 = vmul.f32 %v151_v19, %v148_v20 }
 0x15c   : > { %156 = vadd.xlane.f32.xlu1 %v155_v21 }
 0x1e9   : > { %v157_v23 = vpop.xlane.xlu1 %156 }
 0x1ea   : > { %v158_v25 = vsel %vm154_vm7, %v157_v23, %v148_v20 }
 0x1eb   : > { %v165_v26 = vmul.f32 %v161_v24, %v158_v25 }
 0x1ed   : > { %166 = vadd.xlane.f32.xlu1 %v165_v26 }
 0x27a   : > { %v167_v27 = vpop.xlane.xlu1 %166 }
 0x27b   : > { %v168_v28 = vsel %vm164_vm8, %v167_v27, %v158_v25 }
 0x27c   : > { %v170_v29 = vmul.f32 %v317_v9, %v168_v28 }
 0x27e   : > { %v172_v30 = vsel %vm171_vm9, %v168_v28, %v170_v29 }
 0x27f   : > { %173 = vst [vmem:[#allocation2] sm:$0xff] %v172_v30 }
 0x286   : > { %v177_v31 = vld [vmem:[#allocation2] sm:$0xf] }
 0x287   : > { %179 = vst [vmem:[%s106_s21] sm:$0xf] %v177_v31 }
 0x28e   : > { %v204_v32 = vld [vmem:[%s106_s21] sm:$0xf] }
 0x28f   : > { %205 = vst [vmem:[%s188_s25] sm:$0xf] %v204_v32 }
 0x290 PF: > { %s7_s8 = sadd.s32 1, %s340_s8   ;;  %s402_s6 = smov %s336_s7 }
 0x291   : > { %p4_p5 = scmp.ge.s32.totalorder %s7_s8, 6   ;;  %s403_s7 = smov %s405_s10 }
 0x293   :  { %6 = sbr.rel (!%p4_p5) target bundleno = 2 (0x2), region = 113 }

// kernel: custom-call.12
= control target key start
LH: loop header
LB: loop body
LE: loop exit
PB: predicated region body
PF: predicated region fallthrough
CT: control target
= control target key end

     0   :  { %s352_s6 = smov 0   ;;  %s354_s7 = smov 0   ;;  %s399_s0 = inlined_call_operand.vmem [shape: f32[4,1,4,4], index: 0, kind: input, shape index: {}]   ;;  %s400_s1 = inlined_call_operand.vmem [shape: f32[4,1,4,4], index: 1, kind: output, shape index: {}]  }
   0x1   :  { %s356_s8 = smov 0  }
   0x2 LB: > { %s278_s9 = sadd.s32 4294967295, %s339_s8   ;;  %s33_s10 = sadd.s32 1, %s335_s7  ;;  %s339_s8 = sphi %s356_s8, %s7_s8   ;;  %s335_s7 = sphi %s354_s7, %s402_s7   ;;  %s331_s6 = sphi %s352_s6, %s401_s6  }
   0x3   : > { %p35_p0 = scmp.ge.s32.totalorder %s33_s10, 4  ;;  %p280_p1 = scmp.ge.s32.totalorder %s339_s8, 4 }
   0x4   : > { %s49_s11 = sand.u32 (!%p280_p1), 1, %s339_s8   ;;  %s282_s12 = sshll.u32 (!%p280_p1), %s335_s7, 2 }
   0x5   : > { %s404_s10 = smov (%p35_p0, %s33_s10), 0  ;;  %47 = sbr.rel (%p280_p1) target bundleno = 12 (0xc), region = 16 }
   0x6   : > { %s281_s13 = sshll.u32 (!%p280_p1), %s49_s11, 2  ;;  %s56_s16 = scalar_lea.vmem (!%p280_p1), %s399_s0, %s282_s12 }
   0x7   : > { %v72_v0 = vld [vmem:[%s56_s16] sm:$0xf] (!%p280_p1)  ;;  %s51_s17 = scalar_lea.vmem (!%p280_p1), [#allocation1], %s281_s13 }
   0x8   : > { %73 = vst [vmem:[%s51_s17] sm:$0xf] (!%p280_p1), %v72_v0 }
   0xc PF: > { %p283_p2 = scmp.ge.s32.totalorder %s339_s8, 1  ;;  %p89_p3 = scmp.lt.s32.totalorder %s339_s8, 5 }
   0xe   : > { %p90_p4 = pnand %p283_p2, %p89_p3 }
  0x10   : > { %93 = sbr.rel (%p90_p4) target bundleno = 656 (0x290), region = 50 }
  0x17   : > { %s379_s18 = sand.u32 1, %s278_s9   ;;  %v111_v1 = vlaneseq  ;;  %v341_v11 = vmov -1.0   ;;  %s287_s22 = sshll.u32 %s331_s6, 2 }
  0x18   : > { %s284_s19 = sshll.u32 %s379_s18, 2  ;;  %s187_s25 = scalar_lea.vmem %s400_s1, %s287_s22 }
  0x19   : > { %s102_s20 = scalar_lea.vmem [#allocation1], %s284_s19  ;;  %v112_v3 = vand.u32 127, %v111_v1  ;;  %v115_v4 = vshrl.u32 %v111_v1, 7  ;;  %s106_s21 = scalar_lea.vmem [#allocation3], %s284_s19 }
  0x1a   : > { %v109_v2 = vld [vmem:[%s102_s20] sm:$0xf] }
  0x1b   : > { %110 = vst [vmem:[#allocation0] sm:$0xf] %v109_v2  ;;  %vm113_vm0 = vcmp.lt.s32.totalorder %v112_v3, 4  ;;  %vm122_vm1 = vcmp.le.s32.totalorder %v115_v4, %v112_v3  ;;  %vm117_vm2 = vcmp.eq.s32.totalorder %v115_v4, %v112_v3  ;;  %vm136_vm4 = vcmp.eq.s32.totalorder %v112_v3, 3 }
  0x1c   : > { %vm123_vm3 = vmand %vm122_vm1, %vm113_vm0  ;;  %vm133_vm5 = vcmp.eq.s32.totalorder %v112_v3, %v115_v4  ;;  %v137_v12 = vsel %vm136_vm4, 1.0, %v341_v11  ;;  %vm144_vm6 = vcmp.eq.s32.totalorder %v112_v3, 2  ;;  %vm154_vm7 = vcmp.eq.s32.totalorder %v112_v3, 1 }
  0x1d   : > { %v138_v13 = vsel %vm133_vm5, %v137_v12, 0.0  ;;  %vm163_vm8 = vcmp.eq.s32.totalorder %v112_v3, 0 }
  0x22   : > { %v118_v5 = vld [vmem:[#allocation0] sm:$0xff] }
  0x23   : > { %v119_v6 = vsel %vm117_vm2, %v118_v5, 0.0  ;;  %v124_v7 = vsel %vm123_vm3, %v118_v5, 0.0 }
  0x24   : > { %120 = vadd.xlane.f32.xlu0 %v119_v6 }
  0xb1   : > { %v121_v8 = vpop.xlane.xlu0 %120 }
  0xb2   : > { %315 = vrcp.f32 %v121_v8  ;;  %vm170_vm9 = vweird.f32 %v121_v8 }
  0xbc   : > { %v316_v9 = vpop.eup %315 }
  0xbd   : > { %v126_v10 = vmul.f32 %v316_v9, %v124_v7 }
  0xbf   : > { %127 = vst [vmem:[#allocation4] sm:$0xff] %v126_v10 }
  0xc6   : > { %v140_v14 = vld [vmem:[#allocation4 + $0x2] ss:$0 sm:$0xff]  ;;  %v150_v17 = vld [vmem:[#allocation4 + $0x1] ss:$0 sm:$0xff]  ;;  %v159_v22 = vld [vmem:[#allocation4] ss:$0 sm:$0xff] }
  0xc7   : > { %v141_v15 = vxor.u32 2147483648, %v140_v14  ;;  %v151_v19 = vxor.u32 2147483648, %v150_v17  ;;  %v160_v24 = vxor.u32 2147483648, %v159_v22 }
  0xc9   : > { %v145_v16 = vmul.f32 %v141_v15, %v138_v13 }
  0xcb   : > { %146 = vadd.xlane.f32.xlu0 %v145_v16 }
 0x158   : > { %v147_v18 = vpop.xlane.xlu0 %146 }
 0x159   : > { %v148_v20 = vsel %vm144_vm6, %v147_v18, %v138_v13 }
 0x15a   : > { %v155_v21 = vmul.f32 %v151_v19, %v148_v20 }
 0x15c   : > { %156 = vadd.xlane.f32.xlu1 %v155_v21 }
 0x1e9   : > { %v157_v23 = vpop.xlane.xlu1 %156 }
 0x1ea   : > { %v158_v25 = vsel %vm154_vm7, %v157_v23, %v148_v20 }
 0x1eb   : > { %v164_v26 = vmul.f32 %v160_v24, %v158_v25 }
 0x1ed   : > { %165 = vadd.xlane.f32.xlu1 %v164_v26 }
 0x27a   : > { %v166_v27 = vpop.xlane.xlu1 %165 }
 0x27b   : > { %v167_v28 = vsel %vm163_vm8, %v166_v27, %v158_v25 }
 0x27c   : > { %v169_v29 = vmul.f32 %v316_v9, %v167_v28 }
 0x27e   : > { %v171_v30 = vsel %vm170_vm9, %v167_v28, %v169_v29 }
 0x27f   : > { %172 = vst [vmem:[#allocation2] sm:$0xff] %v171_v30 }
 0x286   : > { %v176_v31 = vld [vmem:[#allocation2] sm:$0xf] }
 0x287   : > { %178 = vst [vmem:[%s106_s21] sm:$0xf] %v176_v31 }
 0x28e   : > { %v203_v32 = vld [vmem:[%s106_s21] sm:$0xf] }
 0x28f   : > { %204 = vst [vmem:[%s187_s25] sm:$0xf] %v203_v32 }
 0x290 PF: > { %s7_s8 = sadd.s32 1, %s339_s8   ;;  %s401_s6 = smov %s335_s7 }
 0x291   : > { %p4_p5 = scmp.ge.s32.totalorder %s7_s8, 6   ;;  %s402_s7 = smov %s404_s10 }
 0x293   :  { %6 = sbr.rel (!%p4_p5) target bundleno = 2 (0x2), region = 112 }

// kernel: network_forward.3
= control target key start
LH: loop header
LB: loop body
LE: loop exit
PB: predicated region body
PF: predicated region fallthrough
CT: control target
= control target key end

     0   :  { %v108_v0 = vlaneseq  ;;  %v416_v3 = vmov 0   ;;  %v417_v5 = vmov 1966171168   ;;  %vm127_vm0 = vcmask 130048   ;;  %s531_s1 = inlined_call_operand.vmem [shape: f32[16,128], index: 1, kind: input, shape index: {}]   ;;  %s532_s5 = inlined_call_operand.vmem [shape: f32[3,1], index: 5, kind: input, shape index: {}]   ;;  %s533_s4 = inlined_call_operand.vmem [shape: f32[16,128], index: 4, kind: input, shape index: {}]   ;;  %s534_s2 = inlined_call_operand.vmem [shape: f32[16,128], index: 2, kind: input, shape index: {}]   ;;  %s535_s0 = inlined_call_operand.vmem [shape: f32[3,16,128], index: 0, kind: input, shape index: {}]   ;;  %s536_s3 = inlined_call_operand.vmem [shape: f32[16,128], index: 3, kind: input, shape index: {}]   ;;  %s537_s7 = inlined_call_operand.vmem [shape: f32[1,128], index: 7, kind: output, shape index: {1}]   ;;  %s538_s8 = inlined_call_operand.vmem [shape: f32[1,128], index: 8, kind: output, shape index: {2}]   ;;  %s539_s6 = inlined_call_operand.vmem [shape: f32[3,128], index: 6, kind: output, shape index: {0}]  }
   0x1   :  { %v32_v1 = vld [vmem:[%s531_s1] sm:$0xff]  ;;  %v33_v2 = vld [vmem:[%s531_s1 + $0x8] sm:$0xff]  ;;  %370 = vset.pattern.permute.xlu0 %v416_v3  ;;  %371 = vset.pattern.permute.xlu1 %v416_v3  ;;  %v233_v6 = vunpack.c.l.s4 %v417_v5  ;;  %v418_v16 = vmov 0.0   ;;  %v29_v5 = vld [vmem:[%s535_s0 + $0x18] sm:$0xff]  ;;  %vm327_vm3 = vcmask 1041409   ;;  %vm330_vm4 = vcmask 1042434  }
   0x2   :  { %v109_v4 = vshrl.u32 %v108_v0, 7  ;;  %v80_v7 = vand.u32 2147483647, %v32_v1  ;;  %v81_v8 = vand.u32 2147483647, %v33_v2  ;;  %v112_v9 = vand.u32 127, %v108_v0 }
   0x3   :  { %v40_v11 = vld [vmem:[%s532_s5] sm:$0x7]  ;;  %v234_v12 = vunpack.c.0.s8 %v233_v6  ;;  %v78_v35 = vmax.f32 %v32_v1, 0.0  ;;  %v79_v37 = vmax.f32 %v33_v2, 0.0  ;;  %v39_v44 = vld [vmem:[%s533_s4 + $0x8] sm:$0xff] }
   0x4   :  { %v110_v10 = vadd.s32 8, %v109_v4  ;;  %v82_v13 = vsub.f32 0.0, %v80_v7  ;;  %v83_v14 = vsub.f32 0.0, %v81_v8  ;;  %vm113_vm1 = vcmp.lt.s32.totalorder %v112_v9, %v109_v4  ;;  %v38_v42 = vld [vmem:[%s533_s4] sm:$0xff]  ;;  %v35_v54 = vld [vmem:[%s534_s2 + $0x8] sm:$0xff] }
   0x5   :  { %v41_v15 = vmul.f32 0.003921569, %v40_v11  ;;  %v348_v17 = vsel %vm113_vm1, 1.0, %v418_v16  ;;  %v237_v18 = vsub.s32 %v234_v12, %v109_v4  ;;  %v257_v24 = vsub.s32 0, %v109_v4  ;;  %v34_v52 = vld [vmem:[%s534_s2] sm:$0xff]  ;;  %v28_v4 = vld [vmem:[%s535_s0 + $0x10] sm:$0xff] }
   0x6   :  { %vm114_vm2 = vcmp.lt.s32.totalorder %v112_v9, %v110_v10  ;;  %v84_v19 = vmul.f32 1.442695, %v82_v13  ;;  %v86_v20 = vmul.f32 1.442695, %v83_v14  ;;  %360 = vmatprep.mubr.msk.f32.mxu0 %vm127_vm0, %v348_v17  ;;  %v27_v6 = vld [vmem:[%s535_s0 + $0x8] sm:$0xff]  ;;  %v44_v7 = vsub.f32 0.0, %v28_v4 }
   0x7   :  { %v473_v21 = vsel %vm114_vm2, 1.0, %v418_v16  ;;  %v238_v22 = vrot.slane %v41_v15, %v237_v18  ;;  %v31_v8 = vld [vmem:[%s535_s0 + $0x28] sm:$0xff]  ;;  %v45_v9 = vsub.f32 0.0, %v29_v5  ;;  %v26_v10 = vld [vmem:[%s535_s0] sm:$0xff]  ;;  %v43_v12 = vsub.f32 0.0, %v27_v6 }
   0x8   :  { %372 = vpow2.f32 %v84_v19  ;;  %v30_v11 = vld [vmem:[%s535_s0 + $0x20] sm:$0xff]  ;;  %v47_v13 = vsub.f32 0.0, %v31_v8  ;;  %v52_v14 = vmul.f32 1.442695, %v44_v7 }
   0x9   :  { %374 = vpow2.f32 %v86_v20  ;;  %v239_v23 = vcombine.high %v238_v22, %v238_v22  ;;  %v246_v25 = vrot.slane %v238_v22, %v237_v18  ;;  %v54_v16 = vmul.f32 1.442695, %v45_v9 }
   0xa   :  { %v46_v17 = vsub.f32 0.0, %v30_v11  ;;  %v58_v19 = vmul.f32 1.442695, %v47_v13 }
   0xb   :  { %v253_v26 = vrot.slane %v239_v23, %v237_v18  ;;  %v254_v27 = vcombine.high %v246_v25, %v246_v25  ;;  %v258_v28 = vrot.slane %v246_v25, %v257_v24  ;;  %v50_v18 = vmul.f32 1.442695, %v43_v12 }
   0xd   :  { %v262_v29 = vrot.slane %v253_v26, %v257_v24  ;;  %268 = vperm.xlu1 %371, %v258_v28   ;;  %v266_v30 = vrot.slane %v254_v27, %v257_v24 }
   0xf   :  { %272 = vperm.xlu0 %370, %v262_v29  }
  0x11   :  { %313 = vperm.xlu1 %371, %v41_v15   ;;  %v42_v15 = vsub.f32 0.0, %v26_v10 }
  0x12   :  { %v373_v31 = vpop.eup %372 }
  0x13   :  { %v375_v32 = vpop.eup %374  ;;  %v88_v33 = vadd.f32 1.0, %v373_v31  ;;  %276 = vperm.xlu0 %370, %v266_v30   ;;  %v48_v20 = vmul.f32 1.442695, %v42_v15 }
  0x14   :  { %v89_v34 = vadd.f32 1.0, %v375_v32 }
  0x15   :  { %376 = vlog2.f32 %v88_v33 }
  0x16   :  { %378 = vlog2.f32 %v89_v34 }
  0x1f   :  { %v377_v36 = vpop.eup %376 }
  0x20   :  { %v379_v38 = vpop.eup %378  ;;  %v91_v39 = vmul.f32 0.6931472, %v377_v36 }
  0x21   :  { %v93_v40 = vmul.f32 0.6931472, %v379_v38 }
  0x22   :  { %v94_v41 = vadd.f32 %v91_v39, %v78_v35 }
  0x23   :  { %v95_v43 = vadd.f32 %v93_v40, %v79_v37 }
  0x24   :  { %v96_v45 = vsub.f32 0.0, %v94_v41 }
  0x25   :  { %v97_v46 = vsub.f32 0.0, %v95_v43 }
  0x26   :  { %v98_v47 = vmul.f32 %v96_v45, %v38_v42 }
  0x27   :  { %v99_v48 = vmul.f32 %v97_v46, %v39_v44 }
  0x28   :  { %v100_v49 = vmul.f32 1.442695, %v98_v47 }
  0x29   :  { %v102_v50 = vmul.f32 1.442695, %v99_v48 }
  0x2a   :  { %380 = vpow2.f32 %v100_v49  ;;  %v37_v49 = vld [vmem:[%s536_s3 + $0x8] sm:$0xff] }
  0x2b   :  { %382 = vpow2.f32 %v102_v50 }
  0x34   :  { %v381_v51 = vpop.eup %380 }
  0x35   :  { %v383_v53 = vpop.eup %382  ;;  %v104_v55 = vsub.f32 1.0, %v381_v51 }
  0x36   :  { %v105_v56 = vsub.f32 1.0, %v383_v53 }
  0x37   :  { %v488_v57 = vmul.f32 %v104_v55, %v34_v52  ;;  %v36_v52 = vld [vmem:[%s536_s3] sm:$0xff] }
  0x38   :  { %v490_v58 = vmul.f32 %v105_v56, %v35_v54 }
  0x39   :  { %v119_v59 = vsub.f32 1.0, %v488_v57 }
  0x3a   :  { %v120_v60 = vsub.f32 1.0, %v490_v58 }
  0x3b   :  { %v121_v61 = vadd.f32 1e-10, %v119_v59 }
  0x3c   :  { %v122_v62 = vadd.f32 1e-10, %v120_v60 }
  0x3d   :  { %384 = vlog2.f32 %v121_v61 }
  0x3e   :  { %386 = vlog2.f32 %v122_v62 }
  0x3f   :  { %388 = vpow2.f32 %v52_v14 }
  0x40   :  { %390 = vpow2.f32 %v54_v16 }
  0x41   :  { %392 = vpow2.f32 %v50_v18 }
  0x42   :  { %394 = vpow2.f32 %v58_v19 }
  0x43   :  { %396 = vpow2.f32 %v48_v20 }
  0x47   :  { %v385_v63 = vpop.eup %384 }
  0x48   :  { %v387_v0 = vpop.eup %386  ;;  %v124_v1 = vmul.f32 0.6931472, %v385_v63 }
  0x49   :  { %v126_v2 = vmul.f32 0.6931472, %v387_v0  ;;  %v389_v22 = vpop.eup %388 }
  0x4a   :  { %v391_v23 = vpop.eup %390  ;;  %v62_v26 = vadd.f32 1.0, %v389_v22 }
  0x4b   :  { %v363_v3 = vpack.c.bf16 %v126_v2, %v124_v1  ;;  %v393_v24 = vpop.eup %392  ;;  %v63_v28 = vadd.f32 1.0, %v391_v23 }
  0x4c   :  { %v395_v25 = vpop.eup %394  ;;  %v61_v30 = vadd.f32 1.0, %v393_v24 }
  0x4d   :  { %364 = vmatprep.subr.bf16.mxu0 %v363_v3  ;;  %v397_v27 = vpop.eup %396  ;;  %v65_v31 = vadd.f32 1.0, %v395_v25 }
  0x4e   :  { %366 = vmatpush3.bf16.msra.mxu0 %v363_v3  ;;  %v60_v32 = vadd.f32 1.0, %v397_v27 }
  0x51   :  { %361 = vmatmul.mubr.msk.f32.vlgmr.msra.gmra.mrb[0].mxu0 %vm127_vm0, %v473_v21  ;;  %v56_v21 = vmul.f32 1.442695, %v46_v17 }
  0x53   :  { %398 = vpow2.f32 %v56_v21 }
  0x54   :  { %400 = vrcp.f32 %v62_v26 }
  0x55   :  { %402 = vrcp.f32 %v63_v28 }
  0x56   :  { %404 = vrcp.f32 %v61_v30 }
  0x57   :  { %406 = vrcp.f32 %v65_v31 }
  0x58   :  { %408 = vrcp.f32 %v60_v32 }
  0x5d   :  { %v399_v29 = vpop.eup %398 }
  0x5e   :  { %v64_v33 = vadd.f32 1.0, %v399_v29  ;;  %v401_v39 = vpop.eup %400 }
  0x5f   :  { %v403_v40 = vpop.eup %402 }
  0x60   :  { %410 = vrcp.f32 %v64_v33  ;;  %v405_v41 = vpop.eup %404 }
  0x61   :  { %v407_v43 = vpop.eup %406 }
  0x62   :  { %v409_v44 = vpop.eup %408 }
  0x6a   :  { %v411_v46 = vpop.eup %410 }
  0x8c   :  { %v269_v42 = vpop.permute.xlu1 %268 }
  0x8d   :  { %v280_v47 = vsub.f32 %v405_v41, %v269_v42  ;;  %v279_v55 = vsub.f32 %v409_v44, %v269_v42 }
  0x8e   :  { %v273_v38 = vpop.permute.xlu0 %272 }
  0x8f   :  { %v282_v53 = vsub.f32 %v403_v40, %v273_v38  ;;  %v281_v59 = vsub.f32 %v401_v39, %v273_v38 }
  0x90   :  { %v314_v26 = vpop.permute.xlu1 %313 }
  0x91   :  { %v316_v39 = vrot.slane %v314_v26, 2 }
  0x92   :  { %v277_v45 = vpop.permute.xlu0 %276 }
  0x93   :  { %v284_v54 = vsub.f32 %v407_v43, %v277_v45  ;;  %v283_v60 = vsub.f32 %v411_v46, %v277_v45 }
 0x124   :  { %v362_v34 = vpop.f32.mrb[0].mxu0 }
 0x125   :  { %v211_v35 = vmul.f32 1.442695, %v362_v34  ;;  %v200_v36 = vpop.f32.mrb[1].mxu0 }
 0x126   :  { %v209_v37 = vmul.f32 1.442695, %v200_v36 }
 0x127   :  { %412 = vpow2.f32 %v211_v35  ;;  %v315_v35 = vrot.slane %v314_v26, 1 }
 0x128   :  { %414 = vpow2.f32 %v209_v37 }
 0x131   :  { %v413_v48 = vpop.eup %412 }
 0x132   :  { %v415_v50 = vpop.eup %414  ;;  %v214_v51 = vmul.f32 %v413_v48, %v490_v58 }
 0x133   :  { %v213_v56 = vmul.f32 %v415_v50, %v488_v57 }
 0x134   :  { %v223_v61 = vmul.f32 %v214_v51, %v37_v49  ;;  %v288_v62 = vmul.f32 %v282_v53, %v214_v51  ;;  %v290_v63 = vmul.f32 %v284_v54, %v214_v51  ;;  %v286_v0 = vmul.f32 %v280_v47, %v214_v51 }
 0x135   :  { %v215_v1 = vadd.f32 %v214_v51, %v213_v56  ;;  %v222_v2 = vmul.f32 %v213_v56, %v36_v52  ;;  %v287_v3 = vmul.f32 %v281_v59, %v213_v56  ;;  %v289_v4 = vmul.f32 %v283_v60, %v213_v56 }
 0x136   :  { %v285_v58 = vmul.f32 %v279_v55, %v213_v56 }
 0x137   :  { %v216_v5 = vrot.slane %v215_v1, 4  ;;  %v224_v6 = vadd.f32 %v223_v61, %v222_v2  ;;  %v298_v7 = vadd.f32 %v288_v62, %v287_v3  ;;  %v305_v8 = vadd.f32 %v290_v63, %v289_v4 }
 0x138   :  { %v291_v9 = vadd.f32 %v286_v0, %v285_v58 }
 0x139   :  { %v217_v10 = vadd.f32 %v216_v5, %v215_v1  ;;  %v225_v11 = vrot.slane %v224_v6, 4  ;;  %v299_v12 = vrot.slane %v298_v7, 4  ;;  %v306_v57 = vrot.slane %v305_v8, 4 }
 0x13a   :  { %v292_v13 = vrot.slane %v291_v9, 4 }
 0x13b   :  { %v218_v14 = vrot.slane %v217_v10, 2  ;;  %v226_v15 = vadd.f32 %v225_v11, %v224_v6  ;;  %v300_v16 = vadd.f32 %v299_v12, %v298_v7  ;;  %v307_v17 = vadd.f32 %v306_v57, %v305_v8 }
 0x13c   :  { %v293_v18 = vadd.f32 %v292_v13, %v291_v9 }
 0x13d   :  { %v219_v19 = vadd.f32 %v218_v14, %v217_v10  ;;  %v227_v20 = vrot.slane %v226_v15, 2  ;;  %v308_v21 = vrot.slane %v307_v17, 2  ;;  %v301_v22 = vrot.slane %v300_v16, 2 }
 0x13e   :  { %v294_v23 = vrot.slane %v293_v18, 2 }
 0x13f   :  { %v220_v24 = vrot.slane %v219_v19, 1  ;;  %v228_v25 = vadd.f32 %v227_v20, %v226_v15  ;;  %v302_v27 = vadd.f32 %v301_v22, %v300_v16  ;;  %v309_v28 = vadd.f32 %v308_v21, %v307_v17 }
 0x140   :  { %v295_v29 = vadd.f32 %v294_v23, %v293_v18 }
 0x141   :  { %v221_v30 = vadd.f32 %v220_v24, %v219_v19  ;;  %v229_v31 = vrot.slane %v228_v25, 1  ;;  %v303_v32 = vrot.slane %v302_v27, 1  ;;  %v310_v33 = vrot.slane %v309_v28, 1 }
 0x142   :  { %v296_v34 = vrot.slane %v295_v29, 1 }
 0x143   :  { %v230_v36 = vadd.f32 %v229_v31, %v228_v25  ;;  %334 = vst [vmem:[%s537_s7] sm:$0x1] %v221_v30  ;;  %v304_v37 = vadd.f32 %v303_v32, %v302_v27  ;;  %v311_v38 = vadd.f32 %v310_v33, %v309_v28 }
 0x144   :  { %v297_v40 = vadd.f32 %v296_v34, %v295_v29 }
 0x145   :  { %335 = vst [vmem:[%s538_s8] sm:$0x1] %v230_v36  ;;  %v321_v41 = vadd.f32 %v315_v35, %v304_v37  ;;  %v322_v42 = vadd.f32 %v316_v39, %v311_v38 }
 0x146   :  { %v320_v43 = vadd.f32 %v314_v26, %v297_v40 }
 0x147   :  { %v326_v44 = vrot.slane %v321_v41, 7  ;;  %v329_v45 = vrot.slane %v322_v42, 6 }
 0x149   :  { %v328_v46 = vsel %vm327_vm3, %v326_v44, %v320_v43 }
 0x14a   :  { %v331_v47 = vsel %vm330_vm4, %v329_v45, %v328_v46 }
 0x14b   :  { %333 = vst [vmem:[%s539_s6] sm:$0x7] %v331_v47 }

// kernel: network_forward.2
= control target key start
LH: loop header
LB: loop body
LE: loop exit
PB: predicated region body
PF: predicated region fallthrough
CT: control target
= control target key end

     0   :  { %v1375_v0 = vmov 0   ;;  %vm157_vm0 = vcmask 261120   ;;  %vm1377_vm1 = vmmov 0   ;;  %s1731_s0 = inlined_call_operand.vmem [shape: bf16[160,128], index: 0, kind: input, shape index: {}]   ;;  %s1732_s2 = inlined_call_operand.vmem [shape: bf16[64,160], index: 2, kind: input, shape index: {}]   ;;  %s1733_s4 = inlined_call_operand.vmem [shape: f32[272,1], index: 4, kind: input, shape index: {}]   ;;  %s1734_s3 = inlined_call_operand.vmem [shape: bf16[288,32], index: 3, kind: input, shape index: {}]   ;;  %s1735_s1 = inlined_call_operand.vmem [shape: bf16[32,128], index: 1, kind: input, shape index: {}]   ;;  %s1736_s6 = inlined_call_operand.vmem [shape: f32[1,128], index: 6, kind: output, shape index: {1}]   ;;  %s1737_s5 = inlined_call_operand.vmem [shape: f32[3,128], index: 5, kind: output, shape index: {0}]  }
   0x1   :  { %164 = vmatprep.subr.bf16.mxu0 %v1375_v0  ;;  %v1417_v1 = vld [vmem:[%s1731_s0] sm:$0xff]   ;;  %1332 = vset.pattern.permute.xlu0 %v1375_v0  ;;  %v1425_v2 = vld [vmem:[%s1731_s0 + $0x8] sm:$0xff]   ;;  %v1432_v3 = vld [vmem:[%s1731_s0 + $0x10] sm:$0xff]  }
   0x2   :  { %1333 = vset.pattern.permute.xlu1 %v1375_v0  ;;  %165 = vmatpush1.bf16.msra.mxu0 %v1417_v1  ;;  %v1439_v4 = vld [vmem:[%s1731_s0 + $0x18] sm:$0xff]   ;;  %v1346_v5 = vld [vmem:[%s1732_s2 + $0x4] ss:$8 sps:$4 sm:$0xff]   ;;  %v57_v7 = vld [vmem:[%s1733_s4 + $0x10] sm:$0xff] }
   0x3   :  { %166 = vmatprep.subr.bf16.mxu0 %v1375_v0  ;;  %v55_v6 = vld [vmem:[%s1733_s4] sm:$0xff]  ;;  %1164 = vmatprep.mubr.msk.bf16.mxu0 %vm157_vm0, %v1346_v5  ;;  %v56_v9 = vld [vmem:[%s1733_s4 + $0x8] sm:$0xff]  ;;  %v58_v10 = vld [vmem:[%s1733_s4 + $0x18] sm:$0xff] }
   0x4   :  { %61 = vperm.xlu0 %1332, %v55_v6   ;;  %v1456_v8 = vld [vmem:[%s1731_s0 + $0x20] sm:$0xff]   ;;  %71 = vperm.xlu1 %1333, %v57_v7   ;;  %v1469_v11 = vld [vmem:[%s1731_s0 + $0x28] sm:$0xff]   ;;  %v1482_v14 = vld [vmem:[%s1731_s0 + $0x30] sm:$0xff]  }
   0x5   :  { %v223_v12 = vld [vmem:[%s1733_s4 + $0x20] sm:$0xff]  ;;  %v224_v13 = vld [vmem:[%s1733_s4 + $0x28] sm:$0xff]  ;;  %v225_v15 = vld [vmem:[%s1733_s4 + $0x30] sm:$0xff] }
   0x6   :  { %167 = vmatpush1.bf16.msra.mxu0 %v1425_v2  ;;  %v226_v16 = vld [vmem:[%s1733_s4 + $0x38] sm:$0xff]  ;;  %v322_v18 = vld [vmem:[%s1733_s4 + $0x40] sm:$0xff]  ;;  %v323_v19 = vld [vmem:[%s1733_s4 + $0x48] sm:$0xff] }
   0x7   :  { %168 = vmatprep.subr.bf16.mxu0 %v1375_v0  ;;  %v1495_v17 = vld [vmem:[%s1731_s0 + $0x38] sm:$0xff]   ;;  %v1508_v20 = vld [vmem:[%s1731_s0 + $0x40] sm:$0xff]   ;;  %v324_v21 = vld [vmem:[%s1733_s4 + $0x50] sm:$0xff] }
   0x8   :  { %66 = vperm.xlu0 %1332, %v56_v9   ;;  %76 = vperm.xlu1 %1333, %v58_v10   ;;  %v325_v22 = vld [vmem:[%s1733_s4 + $0x58] sm:$0xff]  ;;  %v1521_v23 = vld [vmem:[%s1731_s0 + $0x48] sm:$0xff]   ;;  %v421_v24 = vld [vmem:[%s1733_s4 + $0x60] sm:$0xff] }
   0x9   :  { %v422_v25 = vld [vmem:[%s1733_s4 + $0x68] sm:$0xff]  ;;  %v1347_v27 = vld [vmem:[%s1732_s2 + $0x14] ss:$8 sps:$4 sm:$0xff]   ;;  %v520_v30 = vld [vmem:[%s1733_s4 + $0x80] sm:$0xff] }
   0xa   :  { %169 = vmatpush1.bf16.msra.mxu0 %v1432_v3  ;;  %v1344_v26 = vld [vmem:[%s1732_s2] ss:$8 sps:$4 sm:$0xff]   ;;  %v423_v28 = vld [vmem:[%s1733_s4 + $0x70] sm:$0xff]  ;;  %v424_v29 = vld [vmem:[%s1733_s4 + $0x78] sm:$0xff] }
   0xb   :  { %170 = vmatprep.subr.bf16.mxu0 %v1375_v0  ;;  %v521_v31 = vld [vmem:[%s1733_s4 + $0x88] sm:$0xff]  ;;  %v1349_v32 = vld [vmem:[%s1732_s2 + $0x10] ss:$8 sps:$4 sm:$0xff]   ;;  %v696_v35 = vld [vmem:[%s1733_s4 + $0xa0] sm:$0xff] }
   0xc   :  { %229 = vperm.xlu0 %1332, %v223_v12   ;;  %234 = vperm.xlu1 %1333, %v224_v13   ;;  %v522_v33 = vld [vmem:[%s1733_s4 + $0x90] sm:$0xff]  ;;  %v523_v34 = vld [vmem:[%s1733_s4 + $0x98] sm:$0xff]  ;;  %v697_v36 = vld [vmem:[%s1733_s4 + $0xa8] sm:$0xff] }
   0xd   :  { %v698_v37 = vld [vmem:[%s1733_s4 + $0xb0] sm:$0xff]  ;;  %v699_v38 = vld [vmem:[%s1733_s4 + $0xb8] sm:$0xff]  ;;  %v796_v39 = vld [vmem:[%s1733_s4 + $0xc0] sm:$0xff] }
   0xe   :  { %171 = vmatpush1.bf16.msra.mxu0 %v1439_v4  ;;  %v797_v40 = vld [vmem:[%s1733_s4 + $0xc8] sm:$0xff]  ;;  %v798_v41 = vld [vmem:[%s1733_s4 + $0xd0] sm:$0xff]  ;;  %v799_v42 = vld [vmem:[%s1733_s4 + $0xd8] sm:$0xff] }
   0xf   :  { %172 = vmatprep.subr.bf16.mxu0 %v1375_v0  ;;  %v1056_v43 = vld [vmem:[%s1733_s4 + $0xe8] sm:$0xff]  ;;  %v1057_v44 = vld [vmem:[%s1733_s4 + $0xf0] sm:$0xff]  ;;  %v1058_v45 = vld [vmem:[%s1733_s4 + $0xf8] sm:$0xff] }
  0x10   :  { %239 = vperm.xlu0 %1332, %v225_v15   ;;  %244 = vperm.xlu1 %1333, %v226_v16   ;;  %v1059_v46 = vld [vmem:[%s1733_s4 + $0x100] sm:$0xff]  ;;  %v1091_v48 = vld [vmem:[%s1733_s4 + $0x108] sm:$0x7] }
  0x11   :  { %v800_v47 = vld [vmem:[%s1733_s4 + $0xe0] sm:$0x1]  ;;  %v1351_v16 = vld [vmem:[%s1734_s3 + $0x8] sm:$0xff]  }
  0x12   :  { %173 = vmatpush1.bf16.msra.mxu0 %v1456_v8  ;;  %v1350_v49 = vld [vmem:[%s1734_s3] sm:$0xff]  }
  0x13   :  { %174 = vmatprep.subr.bf16.mxu0 %v1375_v0  ;;  %1249 = vmatprep.mubr.msk.bf16.mxu1 %vm157_vm0, %v1350_v49 }
  0x14   :  { %328 = vperm.xlu0 %1332, %v322_v18   ;;  %333 = vperm.xlu1 %1333, %v323_v19   ;;  %v1352_v18 = vld [vmem:[%s1734_s3 + $0x10] sm:$0xff]  }
  0x16   :  { %175 = vmatpush1.bf16.msra.mxu0 %v1469_v11 }
  0x17   :  { %176 = vmatprep.subr.bf16.mxu0 %v1375_v0 }
  0x18   :  { %338 = vperm.xlu0 %1332, %v324_v21   ;;  %343 = vperm.xlu1 %1333, %v325_v22  }
  0x1a   :  { %177 = vmatpush1.bf16.msra.mxu0 %v1482_v14 }
  0x1b   :  { %178 = vmatprep.subr.bf16.mxu0 %v1375_v0 }
  0x1c   :  { %427 = vperm.xlu0 %1332, %v421_v24   ;;  %432 = vperm.xlu1 %1333, %v422_v25  }
  0x1e   :  { %179 = vmatpush1.bf16.msra.mxu0 %v1495_v17 }
  0x1f   :  { %180 = vmatprep.subr.bf16.mxu0 %v1375_v0 }
  0x20   :  { %437 = vperm.xlu0 %1332, %v423_v28   ;;  %442 = vperm.xlu1 %1333, %v424_v29  }
  0x22   :  { %181 = vmatpush1.bf16.msra.mxu0 %v1508_v20 }
  0x23   :  { %182 = vmatprep.subr.bf16.mxu0 %v1375_v0 }
  0x24   :  { %526 = vperm.xlu0 %1332, %v520_v30   ;;  %531 = vperm.xlu1 %1333, %v521_v31  }
  0x26   :  { %183 = vmatpush1.bf16.msra.mxu0 %v1521_v23 }
  0x28   :  { %536 = vperm.xlu0 %1332, %v522_v33   ;;  %541 = vperm.xlu1 %1333, %v523_v34  }
  0x29   :  { %197 = vmatmul.mubr.bf16.vlgmr.msra.gmra.mrb[0].mxu0 %v1344_v26 }
  0x2a   :  { %1165 = vmatprep.mubr.msk.bf16.mxu0 %vm157_vm0, %v1347_v27 }
  0x2c   :  { %702 = vperm.xlu0 %1332, %v696_v35   ;;  %707 = vperm.xlu1 %1333, %v697_v36  }
  0x30   :  { %712 = vperm.xlu0 %1332, %v698_v37   ;;  %717 = vperm.xlu1 %1333, %v699_v38  }
  0x31   :  { %205 = vmatmul.mubr.bf16.gmra.mrb[4].mxu0 %v1349_v32 }
  0x34   :  { %803 = vperm.xlu0 %1332, %v796_v39   ;;  %808 = vperm.xlu1 %1333, %v797_v40   ;;  %v1353_v39 = vld [vmem:[%s1734_s3 + $0x18] sm:$0xff]   ;;  %v1354_v40 = vld [vmem:[%s1734_s3 + $0x20] sm:$0xff]  }
  0x38   :  { %813 = vperm.xlu0 %1332, %v798_v41   ;;  %818 = vperm.xlu1 %1333, %v799_v42  }
  0x3c   :  { %1062 = vperm.xlu0 %1332, %v1056_v43   ;;  %1067 = vperm.xlu1 %1333, %v1057_v44  }
  0x40   :  { %1072 = vperm.xlu0 %1332, %v1058_v45   ;;  %1077 = vperm.xlu1 %1333, %v1059_v46  }
  0x44   :  { %823 = vperm.xlu0 %1332, %v800_v47   ;;  %1094 = vperm.xlu1 %1333, %v1091_v48  }
  0x83   :  { %v62_v50 = vpop.permute.xlu0 %61  ;;  %v72_v58 = vpop.permute.xlu1 %71 }
  0x87   :  { %v67_v54 = vpop.permute.xlu0 %66  ;;  %v77_v6 = vpop.permute.xlu1 %76 }
  0x8b   :  { %v230_v19 = vpop.permute.xlu0 %229  ;;  %v235_v21 = vpop.permute.xlu1 %234 }
  0x8f   :  { %v240_v22 = vpop.permute.xlu0 %239  ;;  %v245_v27 = vpop.permute.xlu1 %244 }
  0x93   :  { %v329_v41 = vpop.permute.xlu0 %328  ;;  %v334_v42 = vpop.permute.xlu1 %333 }
  0x97   :  { %v339_v43 = vpop.permute.xlu0 %338  ;;  %v344_v47 = vpop.permute.xlu1 %343 }
  0xfc   :  { %v198_v51 = vpop.f32.mrb[0].mxu0 }
  0xfd   :  { %v199_v52 = vadd.f32 %v198_v51, %v62_v50  ;;  %v200_v53 = vpop.f32.mrb[1].mxu0 }
  0xfe   :  { %v201_v55 = vpop.f32.mrb[2].mxu0 }
  0xff   :  { %v202_v56 = vadd.f32 %v201_v55, %v67_v54  ;;  %v203_v57 = vpop.f32.mrb[3].mxu0  ;;  %v213_v59 = vmax.f32 %v199_v52, 0.0 }
 0x101   :  { %v214_v60 = vmax.f32 %v202_v56, 0.0 }
 0x103   :  { %v217_v61 = vpack.c.bf16 %v214_v60, %v213_v59  ;;  %v1355_v59 = vld [vmem:[%s1734_s3 + $0x28] sm:$0xff]   ;;  %v1356_v60 = vld [vmem:[%s1734_s3 + $0x30] sm:$0xff]  }
 0x104   :  { %v206_v62 = vpop.f32.mrb[4].mxu0 }
 0x105   :  { %v207_v63 = vadd.f32 %v206_v62, %v72_v58  ;;  %v208_v5 = vpop.f32.mrb[5].mxu0  ;;  %1245 = vmatprep.subr.bf16.mxu1 %v217_v61  ;;  %v433_v62 = vpop.permute.xlu1 %432 }
 0x106   :  { %v209_v7 = vpop.f32.mrb[6].mxu0  ;;  %1246 = vmatpush3.bf16.msra.mxu1 %v217_v61  ;;  %v428_v61 = vpop.permute.xlu0 %427 }
 0x107   :  { %v210_v9 = vadd.f32 %v209_v7, %v77_v6  ;;  %v211_v10 = vpop.f32.mrb[7].mxu0  ;;  %v215_v12 = vmax.f32 %v207_v63, 0.0 }
 0x109   :  { %v216_v13 = vmax.f32 %v210_v9, 0.0  ;;  %v443_v9 = vpop.permute.xlu1 %442 }
 0x10a   :  { %v438_v63 = vpop.permute.xlu0 %437 }
 0x10b   :  { %v218_v15 = vpack.c.bf16 %v216_v13, %v215_v12 }
 0x10d   :  { %1247 = vmatprep.subr.bf16.mxu1 %v218_v15 }
 0x10e   :  { %1248 = vmatpush3.bf16.msra.mxu1 %v218_v15 }
 0x111   :  { %1250 = vmatmul.mubr.msk.bf16.vlgmr.msra.gmra.mrb[0].mxu1 %vm157_vm0, %v1351_v16 }
 0x112   :  { %1257 = vmatprep.mubr.msk.bf16.mxu1 %vm157_vm0, %v1352_v18 }
 0x1e4   :  { %v1251_v24 = vpop.f32.mrb[0].mxu1 }
 0x1e5   :  { %v306_v25 = vadd.f32 %v1251_v24, %v240_v22  ;;  %v297_v26 = vpop.f32.mrb[1].mxu1 }
 0x1e6   :  { %v298_v28 = vadd.f32 %v297_v26, %v230_v19  ;;  %v1252_v29 = vpop.f32.mrb[2].mxu1  ;;  %v1357_v26 = vld [vmem:[%s1734_s3 + $0x38] sm:$0xff]  }
 0x1e7   :  { %v309_v30 = vadd.f32 %v1252_v29, %v245_v27  ;;  %v300_v31 = vpop.f32.mrb[3].mxu1  ;;  %v314_v33 = vmax.f32 %v306_v25, 0.0  ;;  %v1358_v27 = vld [vmem:[%s1732_s2 + $0x24] ss:$8 sps:$4 sm:$0xff]  }
 0x1e8   :  { %v301_v32 = vadd.f32 %v300_v31, %v235_v21  ;;  %v312_v35 = vmax.f32 %v298_v28, 0.0 }
 0x1e9   :  { %v315_v34 = vmax.f32 %v309_v30, 0.0 }
 0x1ea   :  { %v313_v36 = vmax.f32 %v301_v32, 0.0 }
 0x1eb   :  { %v317_v37 = vpack.c.bf16 %v315_v34, %v314_v33 }
 0x1ec   :  { %v316_v38 = vpack.c.bf16 %v313_v36, %v312_v35 }
 0x1ee   :  { %1253 = vmatprep.subr.bf16.mxu1 %v316_v38 }
 0x1ef   :  { %1254 = vmatpush3.bf16.msra.mxu1 %v316_v38 }
 0x1f0   :  { %1255 = vmatprep.subr.bf16.mxu1 %v317_v37 }
 0x1f3   :  { %1256 = vmatpush3.bf16.msra.mxu1 %v317_v37 }
 0x1f6   :  { %1258 = vmatmul.mubr.msk.bf16.vlgmr.msra.gmra.mrb[4].mxu1 %vm157_vm0, %v1353_v39 }
 0x1f7   :  { %1265 = vmatprep.mubr.msk.bf16.mxu1 %vm157_vm0, %v1354_v40 }
 0x2c9   :  { %v1259_v44 = vpop.f32.mrb[4].mxu1 }
 0x2ca   :  { %v405_v45 = vadd.f32 %v1259_v44, %v339_v43  ;;  %v396_v46 = vpop.f32.mrb[5].mxu1 }
 0x2cb   :  { %v397_v48 = vadd.f32 %v396_v46, %v329_v41  ;;  %v1260_v49 = vpop.f32.mrb[6].mxu1 }
 0x2cc   :  { %v408_v50 = vadd.f32 %v1260_v49, %v344_v47  ;;  %v399_v51 = vpop.f32.mrb[7].mxu1  ;;  %v413_v53 = vmax.f32 %v405_v45, 0.0 }
 0x2cd   :  { %v400_v52 = vadd.f32 %v399_v51, %v334_v42  ;;  %v411_v55 = vmax.f32 %v397_v48, 0.0  ;;  %v1365_v51 = vld [vmem:[%s1734_s3 + $0x48] sm:$0xff]  }
 0x2ce   :  { %v414_v54 = vmax.f32 %v408_v50, 0.0 }
 0x2cf   :  { %v412_v56 = vmax.f32 %v400_v52, 0.0  ;;  %v1376_v52 = vmov 0.0  }
 0x2d0   :  { %v416_v57 = vpack.c.bf16 %v414_v54, %v413_v53 }
 0x2d1   :  { %v415_v58 = vpack.c.bf16 %v412_v56, %v411_v55 }
 0x2d3   :  { %1261 = vmatprep.subr.bf16.mxu1 %v415_v58 }
 0x2d4   :  { %1262 = vmatpush3.bf16.msra.mxu1 %v415_v58 }
 0x2d5   :  { %1263 = vmatprep.subr.bf16.mxu1 %v416_v57 }
 0x2d8   :  { %1264 = vmatpush3.bf16.msra.mxu1 %v416_v57 }
 0x2db   :  { %1266 = vmatmul.mubr.msk.bf16.vlgmr.msra.gmra.mrb[8].mxu1 %vm157_vm0, %v1355_v59 }
 0x2dc   :  { %1273 = vmatprep.mubr.msk.bf16.mxu1 %vm157_vm0, %v1356_v60 }
 0x3ae   :  { %v1267_v5 = vpop.f32.mrb[8].mxu1 }
 0x3af   :  { %v504_v6 = vadd.f32 %v1267_v5, %v438_v63  ;;  %v495_v7 = vpop.f32.mrb[9].mxu1 }
 0x3b0   :  { %v496_v10 = vadd.f32 %v495_v7, %v428_v61  ;;  %v1268_v12 = vpop.f32.mrb[10].mxu1 }
 0x3b1   :  { %v507_v13 = vadd.f32 %v1268_v12, %v443_v9  ;;  %v498_v15 = vpop.f32.mrb[11].mxu1  ;;  %v512_v18 = vmax.f32 %v504_v6, 0.0 }
 0x3b2   :  { %v499_v16 = vadd.f32 %v498_v15, %v433_v62  ;;  %v510_v21 = vmax.f32 %v496_v10, 0.0  ;;  %v1369_v15 = vld [vmem:[%s1735_s1] sm:$0xff]  }
 0x3b3   :  { %v513_v19 = vmax.f32 %v507_v13, 0.0 }
 0x3b4   :  { %v511_v22 = vmax.f32 %v499_v16, 0.0  ;;  %v1366_v16 = vld [vmem:[%s1734_s3 + $0x50] sm:$0xff]  }
 0x3b5   :  { %v515_v24 = vpack.c.bf16 %v513_v19, %v512_v18  ;;  %v1367_v18 = vld [vmem:[%s1734_s3 + $0x58] sm:$0xff]   ;;  %v1368_v19 = vld [vmem:[%s1734_s3 + $0x60] ss:$0 sps:$4 sm:$0x11]  }
 0x3b6   :  { %v514_v25 = vpack.c.bf16 %v511_v22, %v510_v21  ;;  %v1370_v21 = vld [vmem:[%s1735_s1 + $0x8] sm:$0xff]   ;;  %v1371_v22 = vld [vmem:[%s1734_s3 + $0x78] sm:$0xff]  }
 0x3b8   :  { %1269 = vmatprep.subr.bf16.mxu1 %v514_v25 }
 0x3b9   :  { %1270 = vmatpush3.bf16.msra.mxu1 %v514_v25  ;;  %v1373_v25 = vld [vmem:[%s1734_s3 + $0x68] sm:$0xff]  }
 0x3ba   :  { %1271 = vmatprep.subr.bf16.mxu1 %v515_v24 }
 0x3bd   :  { %1272 = vmatpush3.bf16.msra.mxu1 %v515_v24  ;;  %v1372_v24 = vld [vmem:[%s1734_s3 + $0x80] sm:$0xff]  }
 0x3be   :  { %633 = vmatprep.subr.bf16.mxu1 %v1375_v0 }
 0x3c0   :  { %1274 = vmatmul.mubr.msk.bf16.vlgmr.msra.gmra.mrb[12].mxu1 %vm157_vm0, %v1357_v26 }
 0x3c1   :  { %634 = vmatpush1.bf16.msra.mxu1 %v1417_v1  ;;  %1186 = vmatprep.mubr.msk.bf16.mxu1 %vm157_vm0, %v1358_v27  ;;  %v1360_v1 = vld [vmem:[%s1732_s2 + $0x20] ss:$8 sps:$4 sm:$0xff]  }
 0x3c2   :  { %635 = vmatprep.subr.bf16.mxu1 %v1375_v0 }
 0x3c5   :  { %636 = vmatpush1.bf16.msra.mxu1 %v1425_v2  ;;  %v1361_v2 = vld [vmem:[%s1732_s2 + $0x34] ss:$8 sps:$4 sm:$0xff]  }
 0x3c6   :  { %637 = vmatprep.subr.bf16.mxu1 %v1375_v0 }
 0x3c9   :  { %638 = vmatpush1.bf16.msra.mxu1 %v1432_v3  ;;  %v1363_v3 = vld [vmem:[%s1732_s2 + $0x30] ss:$8 sps:$4 sm:$0xff]  }
 0x3ca   :  { %639 = vmatprep.subr.bf16.mxu1 %v1375_v0 }
 0x3cd   :  { %640 = vmatpush1.bf16.msra.mxu1 %v1439_v4 }
 0x3ce   :  { %641 = vmatprep.subr.bf16.mxu1 %v1375_v0 }
 0x3d1   :  { %642 = vmatpush1.bf16.msra.mxu1 %v1456_v8 }
 0x3d2   :  { %643 = vmatprep.subr.bf16.mxu1 %v1375_v0 }
 0x3d5   :  { %644 = vmatpush1.bf16.msra.mxu1 %v1469_v11 }
 0x3d6   :  { %645 = vmatprep.subr.bf16.mxu1 %v1375_v0 }
 0x3d9   :  { %646 = vmatpush1.bf16.msra.mxu1 %v1482_v14 }
 0x3da   :  { %647 = vmatprep.subr.bf16.mxu1 %v1375_v0 }
 0x3dd   :  { %648 = vmatpush1.bf16.msra.mxu1 %v1495_v17  ;;  %v527_v17 = vpop.permute.xlu0 %526 }
 0x3de   :  { %649 = vmatprep.subr.bf16.mxu1 %v1375_v0 }
 0x3e1   :  { %650 = vmatpush1.bf16.msra.mxu1 %v1508_v20  ;;  %v537_v37 = vpop.permute.xlu0 %536 }
 0x3e2   :  { %651 = vmatprep.subr.bf16.mxu1 %v1375_v0  ;;  %v1364_v0 = vld [vmem:[%s1734_s3 + $0x40] sm:$0xff]  }
 0x3e3   :  { %1281 = vmatprep.mubr.msk.bf16.mxu0 %vm157_vm0, %v1364_v0 }
 0x3e5   :  { %652 = vmatpush1.bf16.msra.mxu1 %v1521_v23  ;;  %v532_v23 = vpop.permute.xlu1 %531  ;;  %v703_v53 = vpop.permute.xlu0 %702 }
 0x3e6   :  { %1317 = vmatprep.subr.bf16.mxu1 %v1376_v52 }
 0x3e8   :  { %666 = vmatmul.mubr.bf16.vlgmr.msra.gmra.mrb[16].mxu1 %v1360_v1 }
 0x3e9   :  { %1187 = vmatprep.mubr.msk.bf16.mxu1 %vm157_vm0, %v1361_v2  ;;  %v542_v40 = vpop.permute.xlu1 %541  ;;  %v713_v55 = vpop.permute.xlu0 %712 }
 0x3ed   :  { %v708_v54 = vpop.permute.xlu1 %707  ;;  %v804_v26 = vpop.permute.xlu0 %803 }
 0x3f0   :  { %674 = vmatmul.mubr.bf16.gmra.mrb[20].mxu1 %v1363_v3 }
 0x3f1   :  { %1321 = vmatprep.mubr.msk.bf16.mxu1 %vm1377_vm1, %v1376_v52  ;;  %v718_v59 = vpop.permute.xlu1 %717  ;;  %v814_v27 = vpop.permute.xlu0 %813 }
 0x3f5   :  { %v809_v3 = vpop.permute.xlu1 %808 }
 0x493   :  { %v1275_v4 = vpop.f32.mrb[12].mxu1 }
 0x494   :  { %v594_v8 = vpop.f32.mrb[13].mxu1  ;;  %v603_v38 = vadd.f32 %v1275_v4, %v537_v37 }
 0x495   :  { %v1276_v11 = vpop.f32.mrb[14].mxu1  ;;  %v595_v20 = vadd.f32 %v594_v8, %v527_v17 }
 0x496   :  { %v597_v14 = vpop.f32.mrb[15].mxu1  ;;  %v606_v42 = vadd.f32 %v1276_v11, %v542_v40 }
 0x497   :  { %v598_v29 = vadd.f32 %v597_v14, %v532_v23  ;;  %v1063_v14 = vpop.permute.xlu0 %1062  ;;  %v819_v23 = vpop.permute.xlu1 %818 }
 0x4bb   :  { %v667_v28 = vpop.f32.mrb[16].mxu1 }
 0x4bc   :  { %v682_v30 = vadd.f32 %v667_v28, %v595_v20  ;;  %v669_v31 = vpop.f32.mrb[17].mxu1 }
 0x4bd   :  { %v670_v32 = vpop.f32.mrb[18].mxu1 }
 0x4be   :  { %v683_v33 = vadd.f32 %v670_v32, %v598_v29  ;;  %v672_v34 = vpop.f32.mrb[19].mxu1  ;;  %v686_v35 = vmax.f32 %v682_v30, 0.0  ;;  %v1073_v29 = vpop.permute.xlu0 %1072 }
 0x4c0   :  { %v687_v36 = vmax.f32 %v683_v33, 0.0 }
 0x4c2   :  { %v690_v39 = vpack.c.bf16 %v687_v36, %v686_v35  ;;  %v1374_v35 = vld [vmem:[%s1734_s3 + $0x70] sm:$0xff]   ;;  %v824_v36 = vpop.permute.xlu0 %823 }
 0x4c3   :  { %v675_v41 = vpop.f32.mrb[20].mxu1 }
 0x4c4   :  { %v684_v43 = vadd.f32 %v675_v41, %v603_v38  ;;  %v677_v44 = vpop.f32.mrb[21].mxu1  ;;  %1277 = vmatprep.subr.bf16.mxu0 %v690_v39 }
 0x4c5   :  { %v678_v45 = vpop.f32.mrb[22].mxu1  ;;  %1278 = vmatpush3.bf16.msra.mxu0 %v690_v39 }
 0x4c6   :  { %v685_v46 = vadd.f32 %v678_v45, %v606_v42  ;;  %v680_v47 = vpop.f32.mrb[23].mxu1  ;;  %v688_v48 = vmax.f32 %v684_v43, 0.0  ;;  %v1068_v42 = vpop.permute.xlu1 %1067 }
 0x4c8   :  { %v689_v49 = vmax.f32 %v685_v46, 0.0 }
 0x4ca   :  { %v691_v50 = vpack.c.bf16 %v689_v49, %v688_v48  ;;  %v1078_v46 = vpop.permute.xlu1 %1077 }
 0x4cc   :  { %1279 = vmatprep.subr.bf16.mxu0 %v691_v50 }
 0x4cd   :  { %1280 = vmatpush3.bf16.msra.mxu0 %v691_v50 }
 0x4ce   :  { %1285 = vmatprep.subr.bf16.mxu0 %v1376_v52 }
 0x4d0   :  { %1282 = vmatmul.mubr.msk.bf16.vlgmr.msra.gmra.mrb[8].mxu0 %vm157_vm0, %v1365_v51 }
 0x4d1   :  { %1289 = vmatprep.mubr.msk.bf16.mxu0 %vm1377_vm1, %v1376_v52 }
 0x5a3   :  { %v1283_v56 = vpop.f32.mrb[8].mxu0 }
 0x5a4   :  { %v779_v57 = vadd.f32 %v1283_v56, %v713_v55  ;;  %v770_v58 = vpop.f32.mrb[9].mxu0 }
 0x5a5   :  { %v771_v60 = vadd.f32 %v770_v58, %v703_v53  ;;  %v1284_v61 = vpop.f32.mrb[10].mxu0 }
 0x5a6   :  { %v782_v62 = vadd.f32 %v1284_v61, %v718_v59  ;;  %v773_v63 = vpop.f32.mrb[11].mxu0  ;;  %v787_v6 = vmax.f32 %v779_v57, 0.0  ;;  %v1088_v59 = vld [vmem:[%s1734_s3 + $0x88] sm:$0x3] }
 0x5a7   :  { %v774_v5 = vadd.f32 %v773_v63, %v708_v54  ;;  %v785_v9 = vmax.f32 %v771_v60, 0.0  ;;  %v1095_v60 = vpop.permute.xlu1 %1094 }
 0x5a8   :  { %v788_v7 = vmax.f32 %v782_v62, 0.0 }
 0x5a9   :  { %v786_v10 = vmax.f32 %v774_v5, 0.0 }
 0x5aa   :  { %v790_v12 = vpack.c.bf16 %v788_v7, %v787_v6 }
 0x5ab   :  { %v789_v13 = vpack.c.bf16 %v786_v10, %v785_v9 }
 0x5ad   :  { %1286 = vmatpush3.bf16.msra.mxu0 %v789_v13 }
 0x5ae   :  { %1287 = vmatprep.subr.bf16.mxu0 %v1376_v52 }
 0x5b1   :  { %1288 = vmatpush3.bf16.msra.mxu0 %v790_v12 }
 0x5b2   :  { %1301 = vmatprep.subr.bf16.mxu0 %v1369_v15 }
 0x5b4   :  { %1290 = vmatmul.mubr.msk.bf16.vlgmr.msra.gmra.mrb[12].mxu0 %vm157_vm0, %v1366_v16 }
 0x5b5   :  { %1293 = vmatprep.mubr.msk.bf16.mxu0 %vm1377_vm1, %v1376_v52  ;;  %1302 = vmatpush3.bf16.msra.mxu0 %v1369_v15 }
 0x5b6   :  { %1303 = vmatprep.subr.bf16.mxu0 %v1370_v21 }
 0x5b9   :  { %1304 = vmatpush3.bf16.msra.mxu0 %v1370_v21 }
 0x5bc   :  { %1294 = vmatmul.mubr.msk.bf16.gmra.mrb[16].mxu0 %vm157_vm0, %v1367_v18 }
 0x5bd   :  { %1297 = vmatprep.mubr.msk.bf16.mxu0 %vm1377_vm1, %v1376_v52 }
 0x5c4   :  { %1298 = vmatmul.mubr.msk.bf16.gmra.mrb[20].mxu0 %vm157_vm0, %v1368_v19 }
 0x5c5   :  { %1305 = vmatprep.mubr.msk.bf16.mxu0 %vm157_vm0, %v1371_v22 }
 0x5cc   :  { %1306 = vmatmul.mubr.msk.bf16.vlgmr.msra.gmra.mrb[24].mxu0 %vm157_vm0, %v1372_v24 }
 0x5cd   :  { %1313 = vmatprep.mubr.msk.bf16.mxu0 %vm157_vm0, %v1373_v25 }
 0x687   :  { %v882_v1 = vpop.f32.mrb[12].mxu0 }
 0x688   :  { %v1291_v2 = vpop.f32.mrb[13].mxu0  ;;  %v883_v4 = vadd.f32 %v882_v1, %v804_v26 }
 0x689   :  { %v885_v0 = vpop.f32.mrb[14].mxu0 }
 0x68a   :  { %v886_v8 = vadd.f32 %v885_v0, %v809_v3  ;;  %v1292_v11 = vpop.f32.mrb[15].mxu0 }
 0x68c   :  { %v908_v17 = vpack.c.bf16 %v886_v8, %v883_v4 }
 0x68e   :  { %1309 = vmatprep.subr.bf16.mxu0 %v908_v17 }
 0x68f   :  { %v890_v20 = vpop.f32.mrb[16].mxu0  ;;  %1310 = vmatpush3.bf16.msra.mxu0 %v908_v17 }
 0x690   :  { %v1295_v28 = vpop.f32.mrb[17].mxu0  ;;  %v891_v31 = vadd.f32 %v890_v20, %v814_v27 }
 0x691   :  { %v893_v30 = vpop.f32.mrb[18].mxu0 }
 0x692   :  { %v894_v32 = vadd.f32 %v893_v30, %v819_v23  ;;  %v1296_v33 = vpop.f32.mrb[19].mxu0 }
 0x694   :  { %v909_v34 = vpack.c.bf16 %v894_v32, %v891_v31 }
 0x696   :  { %1311 = vmatprep.subr.bf16.mxu0 %v909_v34 }
 0x697   :  { %v898_v37 = vpop.f32.mrb[20].mxu0  ;;  %1312 = vmatpush3.bf16.msra.mxu0 %v909_v34 }
 0x698   :  { %v899_v38 = vadd.f32 %v898_v37, %v824_v36  ;;  %v1299_v39 = vpop.f32.mrb[21].mxu0 }
 0x699   :  { %v901_v40 = vpop.f32.mrb[22].mxu0 }
 0x69a   :  { %1141 = vst [vmem:[%s1736_s6] sm:$0x1] %v899_v38  ;;  %1314 = vmatmul.mubr.msk.bf16.vlgmr.msra.gmra.mrb[24].mxu0 %vm157_vm0, %v1374_v35  ;;  %v1300_v41 = vpop.f32.mrb[23].mxu0 }
 0x76d   :  { %v1315_v43 = vpop.f32.mrb[24].mxu0 }
 0x76e   :  { %v1082_v44 = vadd.f32 %v1315_v43, %v1073_v29  ;;  %v1041_v45 = vpop.f32.mrb[25].mxu0 }
 0x76f   :  { %v1080_v47 = vadd.f32 %v1063_v14, %v1041_v45  ;;  %v1316_v48 = vpop.f32.mrb[26].mxu0 }
 0x770   :  { %v1083_v49 = vadd.f32 %v1316_v48, %v1078_v46  ;;  %v1044_v50 = vpop.f32.mrb[27].mxu0  ;;  %v1086_v53 = vmax.f32 %v1082_v44, 0.0 }
 0x771   :  { %v1081_v51 = vadd.f32 %v1068_v42, %v1044_v50  ;;  %v1084_v55 = vmax.f32 %v1080_v47, 0.0 }
 0x772   :  { %v1087_v54 = vmax.f32 %v1083_v49, 0.0 }
 0x773   :  { %v1085_v56 = vmax.f32 %v1081_v51, 0.0 }
 0x774   :  { %v1090_v57 = vpack.c.bf16 %v1087_v54, %v1086_v53 }
 0x775   :  { %v1089_v58 = vpack.c.bf16 %v1085_v56, %v1084_v55 }
 0x777   :  { %1318 = vmatpush3.bf16.msra.mxu1 %v1089_v58 }
 0x778   :  { %1319 = vmatprep.subr.bf16.mxu1 %v1376_v52 }
 0x77b   :  { %1320 = vmatpush3.bf16.msra.mxu1 %v1090_v57 }
 0x77e   :  { %1322 = vmatmul.mubr.msk.bf16.vlgmr.msra.gmra.mrb[24].mxu1 %vm157_vm0, %v1088_v59 }
 0x851   :  { %v1134_v61 = vpop.f32.mrb[24].mxu1 }
 0x852   :  { %v1135_v62 = vadd.f32 %v1134_v61, %v1095_v60  ;;  %v1323_v63 = vpop.f32.mrb[25].mxu1 }
 0x853   :  { %v1137_v5 = vpop.f32.mrb[26].mxu1 }
 0x854   :  { %1140 = vst [vmem:[%s1737_s5] sm:$0x7] %v1135_v62  ;;  %v1324_v6 = vpop.f32.mrb[27].mxu1 }

</bundles_post_ra>
